<compile_context>
chip_gen: v6e
topology: v6e:2x2x1
jax: 0.10.0
libtpu: 0.0.40
codegen_flags: <defaults>
</compile_context>

<pallas_src>
import jax
import jax.numpy as jnp
from jax.experimental import pallas as pl
from jax.experimental.pallas import tpu as pltpu

IN_FEATURES = 9216
HIDDEN = 128
OUT_FEATURES = 10


def _round_up(x, m):
    return (x + m - 1) // m * m


def net2_kernel(x_ref, w1_ref, b1_ref, w2_ref, b2_ref, o_ref):
    # fc1: cast x to bf16 in-register (w1 already stored bf16), f32 accumulate on the MXU.
    x_bf = x_ref[...].astype(jnp.bfloat16)
    h = jnp.dot(x_bf, w1_ref[...], preferred_element_type=jnp.float32)
    # bias + relu; dropout2 (p=0.5) is identity in eval mode.
    h = jnp.maximum(h + b1_ref[...], 0.0)
    # fc2 (f32) + log_softmax.
    logits = jnp.dot(h, w2_ref[...], preferred_element_type=jnp.float32) + b2_ref[...]
    m = jnp.max(logits, axis=-1, keepdims=True)
    shifted = logits - m
    lse = jnp.log(jnp.sum(jnp.exp(shifted), axis=-1, keepdims=True))
    o_ref[...] = (shifted - lse).astype(o_ref.dtype)


def net2_forward(x, w1_bf, b1, w2, b2, *, tb=None):
    """x: [B, 9216] f32; w1_bf: [9216, 128] bf16; b1: [1, 128]; w2: [128, 10]; b2: [1, 10]."""
    B = x.shape[0]
    assert x.shape[1] == IN_FEATURES
    assert w1_bf.shape == (IN_FEATURES, HIDDEN) and w1_bf.dtype == jnp.bfloat16

    # Batch tile: multiple of 8 (f32 sublane), capped at 128 so VMEM stays bounded and the
    # batch axis can be megacore-sharded on v7x when B >= 2*tb. Partial last tiles are
    # handled by Pallas (no host-side padding).
    if tb is None:
        tb = min(128, _round_up(B, 8))
    grid = (pl.cdiv(B, tb),)

    cost = pl.CostEstimate(
        flops=2 * B * IN_FEATURES * HIDDEN + 2 * B * HIDDEN * OUT_FEATURES,
        transcendentals=B * (OUT_FEATURES + 1),
        bytes_accessed=(B * IN_FEATURES * 4          # x (f32, read once)
                        + IN_FEATURES * HIDDEN * 2   # w1 (bf16, read once)
                        + HIDDEN * 4 + HIDDEN * OUT_FEATURES * 4 + OUT_FEATURES * 4
                        + B * OUT_FEATURES * 4),     # output
    )

    out = pl.pallas_call(
        net2_kernel,
        out_shape=jax.ShapeDtypeStruct((B, OUT_FEATURES), jnp.float32),
        grid_spec=pltpu.PrefetchScalarGridSpec(
            num_scalar_prefetch=0,
            grid=grid,
            in_specs=[
                pl.BlockSpec((tb, IN_FEATURES), lambda b: (b, 0)),           # x (streams over batch)
                pl.BlockSpec((IN_FEATURES, HIDDEN), lambda b: (0, 0)),       # w1 (VMEM-resident)
                pl.BlockSpec((1, HIDDEN), lambda b: (0, 0)),                 # b1
                pl.BlockSpec((HIDDEN, OUT_FEATURES), lambda b: (0, 0)),      # w2
                pl.BlockSpec((1, OUT_FEATURES), lambda b: (0, 0)),           # b2
            ],
            out_specs=pl.BlockSpec((tb, OUT_FEATURES), lambda b: (b, 0)),
        ),
        compiler_params=pltpu.CompilerParams(
            dimension_semantics=("parallel",),
            vmem_limit_bytes=32 << 20,
        ),
        cost_estimate=cost,
    )(x, w1_bf, b1, w2, b2)
    return out


def init_params(key):
    # Deterministic init mimicking PyTorch nn.Linear default: U(-1/sqrt(fan_in), 1/sqrt(fan_in)).
    k1, k2, k3, k4 = jax.random.split(key, 4)
    bound1 = 1.0 / jnp.sqrt(IN_FEATURES)
    bound2 = 1.0 / jnp.sqrt(HIDDEN)
    # Stored already transposed [in, out]; w1 pre-cast to bf16 ONCE as the persistent param
    # (dominant HBM read halved; no per-call cast).
    w1_bf = jax.random.uniform(k1, (IN_FEATURES, HIDDEN), jnp.float32,
                               -bound1, bound1).astype(jnp.bfloat16)
    b1 = jax.random.uniform(k2, (1, HIDDEN), jnp.float32, -bound1, bound1)
    w2 = jax.random.uniform(k3, (HIDDEN, OUT_FEATURES), jnp.float32, -bound2, bound2)
    b2 = jax.random.uniform(k4, (1, OUT_FEATURES), jnp.float32, -bound2, bound2)
    return w1_bf, b1, w2, b2


def reference_forward(x, w1_bf, b1, w2, b2):
    # Same numerics as the kernel: bf16 fc1 operands, f32 accumulate, f32 fc2/softmax.
    h = jnp.dot(x.astype(jnp.bfloat16), w1_bf, preferred_element_type=jnp.float32) + b1
    h = jnp.maximum(h, 0.0)
    logits = h @ w2 + b2
    return jax.nn.log_softmax(logits, axis=1)


if __name__ == "__main__":
    key = jax.random.PRNGKey(0)
    kx, kp = jax.random.split(key)
    B = 8
    x = jax.random.normal(kx, (B, IN_FEATURES), jnp.float32)
    w1_bf, b1, w2, b2 = init_params(kp)

    out = net2_forward(x, w1_bf, b1, w2, b2)
    out = jax.block_until_ready(out)

    ref = reference_forward(x, w1_bf, b1, w2, b2)
    assert out.shape == (B, OUT_FEATURES)
    assert jnp.allclose(out, ref, atol=1e-3, rtol=1e-3), "mismatch vs reference"
    print("KERNEL_OK")
</pallas_src>

<mosaic_0001>
module attributes {stable_mosaic.version = 11 : i64} {
  func.func @net2_kernel(%arg0: i32, %arg1: memref<8x9216xf32, #tpu.memory_space<vmem>>, %arg2: memref<9216x128xbf16, #tpu.memory_space<vmem>>, %arg3: memref<1x128xf32, #tpu.memory_space<vmem>>, %arg4: memref<128x10xf32, #tpu.memory_space<vmem>>, %arg5: memref<1x10xf32, #tpu.memory_space<vmem>>, %arg6: memref<8x10xf32, #tpu.memory_space<vmem>>) attributes {dimension_semantics = [#tpu.dimension_semantics<parallel>], iteration_bounds = array<i64: 1>, scalar_prefetch = 0 : i64, scratch_operands = 0 : i64, tpu.core_type = #tpu.core_type<tc>, window_params = [{transform_indices = @transform_0, window_bounds = array<i64: 8, 9216>}, {pipeline_mode = #tpu.pipeline_mode<synchronous>, transform_indices = @transform_1, window_bounds = array<i64: 9216, 128>}, {pipeline_mode = #tpu.pipeline_mode<synchronous>, transform_indices = @transform_2, window_bounds = array<i64: 1, 128>}, {pipeline_mode = #tpu.pipeline_mode<synchronous>, transform_indices = @transform_3, window_bounds = array<i64: 128, 10>}, {pipeline_mode = #tpu.pipeline_mode<synchronous>, transform_indices = @transform_4, window_bounds = array<i64: 1, 10>}, {transform_indices = @transform_5, window_bounds = array<i64: 8, 10>}]} {
    %c0 = arith.constant 0 : index
    %c0_0 = arith.constant 0 : index
    %0 = vector.load %arg1[%c0, %c0_0] : memref<8x9216xf32, #tpu.memory_space<vmem>>, vector<8x9216xf32>
    %1 = arith.truncf %0 : vector<8x9216xf32> to vector<8x9216xbf16>
    %c0_1 = arith.constant 0 : index
    %c0_2 = arith.constant 0 : index
    %2 = vector.load %arg2[%c0_1, %c0_2] : memref<9216x128xbf16, #tpu.memory_space<vmem>>, vector<9216x128xbf16>
    %cst = arith.constant dense<0.000000e+00> : vector<8x128xf32>
    %3 = tpu.matmul %1, %2, %cst {dimension_numbers = #tpu.dot_dimension_numbers<[1], [0], [0], [1], [0, 0, 1, 1], [], []>} : vector<8x9216xbf16>, vector<9216x128xbf16>, vector<8x128xf32> -> vector<8x128xf32>
    %c0_3 = arith.constant 0 : index
    %c0_4 = arith.constant 0 : index
    %4 = vector.load %arg3[%c0_3, %c0_4] : memref<1x128xf32, #tpu.memory_space<vmem>>, vector<1x128xf32>
    %5 = vector.broadcast %4 : vector<1x128xf32> to vector<8x128xf32>
    %6 = arith.addf %3, %5 : vector<8x128xf32>
    %cst_5 = arith.constant 0.000000e+00 : f32
    %7 = vector.broadcast %cst_5 : f32 to vector<8x128xf32>
    %8 = arith.maximumf %6, %7 : vector<8x128xf32>
    %c0_6 = arith.constant 0 : index
    %c0_7 = arith.constant 0 : index
    %9 = vector.load %arg4[%c0_6, %c0_7] : memref<128x10xf32, #tpu.memory_space<vmem>>, vector<128x10xf32>
    %cst_8 = arith.constant dense<0.000000e+00> : vector<8x10xf32>
    %10 = tpu.matmul %8, %9, %cst_8 {dimension_numbers = #tpu.dot_dimension_numbers<[1], [0], [0], [1], [0, 0, 1, 1], [], []>} : vector<8x128xf32>, vector<128x10xf32>, vector<8x10xf32> -> vector<8x10xf32>
    %c0_9 = arith.constant 0 : index
    %c0_10 = arith.constant 0 : index
    %11 = vector.load %arg5[%c0_9, %c0_10] : memref<1x10xf32, #tpu.memory_space<vmem>>, vector<1x10xf32>
    %12 = vector.broadcast %11 : vector<1x10xf32> to vector<8x10xf32>
    %13 = arith.addf %10, %12 : vector<8x10xf32>
    %cst_11 = arith.constant dense<0xFF800000> : vector<8xf32>
    %14 = vector.multi_reduction <maximumf>, %13, %cst_11 [1] : vector<8x10xf32> to vector<8xf32>
    %15 = vector.shape_cast %14 : vector<8xf32> to vector<8x1xf32>
    %16 = vector.broadcast %15 : vector<8x1xf32> to vector<8x10xf32>
    %17 = arith.subf %13, %16 : vector<8x10xf32>
    %18 = math.exp %17 : vector<8x10xf32>
    %cst_12 = arith.constant dense<0.000000e+00> : vector<8xf32>
    %19 = vector.multi_reduction <add>, %18, %cst_12 [1] : vector<8x10xf32> to vector<8xf32>
    %20 = vector.shape_cast %19 : vector<8xf32> to vector<8x1xf32>
    %21 = math.log %20 : vector<8x1xf32>
    %22 = vector.broadcast %21 : vector<8x1xf32> to vector<8x10xf32>
    %23 = arith.subf %17, %22 : vector<8x10xf32>
    %c0_13 = arith.constant 0 : index
    %c0_14 = arith.constant 0 : index
    %24 = vector.load %arg6[%c0_13, %c0_14] : memref<8x10xf32, #tpu.memory_space<vmem>>, vector<8x10xf32>
    tpu.vector_store %arg6[%c0_13, %c0_14], %23 {strides = array<i32>} : memref<8x10xf32, #tpu.memory_space<vmem>>, vector<8x10xf32>,
    return
  }
  func.func @transform_0(%arg0: i32) -> (i32, i32) {
    %c0_i32 = arith.constant 0 : i32
    %c0_i32_0 = arith.constant 0 : i32
    return %arg0, %c0_i32 : i32, i32
  }
  func.func @transform_1(%arg0: i32) -> (i32, i32) {
    %c0_i32 = arith.constant 0 : i32
    %c0_i32_0 = arith.constant 0 : i32
    %c0_i32_1 = arith.constant 0 : i32
    return %c0_i32, %c0_i32_0 : i32, i32
  }
  func.func @transform_2(%arg0: i32) -> (i32, i32) {
    %c0_i32 = arith.constant 0 : i32
    %c0_i32_0 = arith.constant 0 : i32
    %c0_i32_1 = arith.constant 0 : i32
    return %c0_i32, %c0_i32_0 : i32, i32
  }
  func.func @transform_3(%arg0: i32) -> (i32, i32) {
    %c0_i32 = arith.constant 0 : i32
    %c0_i32_0 = arith.constant 0 : i32
    %c0_i32_1 = arith.constant 0 : i32
    return %c0_i32, %c0_i32_0 : i32, i32
  }
  func.func @transform_4(%arg0: i32) -> (i32, i32) {
    %c0_i32 = arith.constant 0 : i32
    %c0_i32_0 = arith.constant 0 : i32
    %c0_i32_1 = arith.constant 0 : i32
    return %c0_i32, %c0_i32_0 : i32, i32
  }
  func.func @transform_5(%arg0: i32) -> (i32, i32) {
    %c0_i32 = arith.constant 0 : i32
    %c0_i32_0 = arith.constant 0 : i32
    return %arg0, %c0_i32 : i32, i32
  }
}

</mosaic_0001>

<bundles_post_ra>
// kernel: tpu_custom_call.1
= control target key start
LH: loop header
LB: loop body
LE: loop exit
PB: predicated region body
PF: predicated region fallthrough
CT: control target
= control target key end

     0   :  { %10 = vsyncpa [#allocation3], 0  ;;  %s8652_s0 = inlined_call_operand.hbm [shape: f32[8,9216], index: 0, kind: input, shape index: {}]   ;;  %s8653_s1 = inlined_call_operand.hbm [shape: bf16[9216,128], index: 1, kind: input, shape index: {}]   ;;  %s8654_s2 = inlined_call_operand.hbm [shape: f32[1,128], index: 2, kind: input, shape index: {}]   ;;  %s8655_s3 = inlined_call_operand.vmem [shape: f32[128,10], index: 3, kind: input, shape index: {}]   ;;  %s8656_s4 = inlined_call_operand.hbm [shape: f32[1,10], index: 4, kind: input, shape index: {}]   ;;  %s8657_s5 = inlined_call_operand.hbm [shape: f32[8,10], index: 5, kind: output, shape index: {}]  }
   0x1   :  { %11 = vsyncpa [#allocation6], 0 }
   0x2   :  { %12 = vsyncpa [#allocation9], 0 }
   0x3   :  { %13 = vsyncpa [#allocation4], 0  ;;  %s8514_s18 = smov [#allocation5]  }
   0x4   :  { %s29_s19 = sshll.u32 %s8514_s18, 4  ;;  %s30_s19 = int_to_ptr.vmem [resolvable:$true] %s29_s19 }
   0x5   :  { %s8414_s20 = scalar_lea.vmem %s30_s19, 73728  ;;  %p8419_p1 = scmp.lt.s32.totalorder %s30_s19, %s30_s19 }
   0x6   :  { %p8415_p0 = scmp.ne.s32.totalorder %s30_s19, %s8414_s20  ;;  %p8420_p2 = scmp.lt.s32.totalorder %s8414_s20, %s8414_s20 }
   0x8   :  { %p8421_p3 = por %p8420_p2, %p8419_p1 }
   0xa   :  { %p8422_p4 = pnand %p8421_p3, %p8415_p0 }
   0xc   :  { %8425 = shalt.err (!%p8422_p4)
}
   0xd   :  { %s8515_s21 = smov 64   ;;  %s8516_s22 = smov 4  }
   0xe   :  { %35 = dma.hbm_to_vmem [thread:$0]  %s8653_s1, 73728, %s30_s19, [#allocation6], %s8515_s21, %s8515_s21, %s8516_s22  }
   0xf   :  { %s8517_s25 = smov [#allocation2]   ;;  %s8518_s27 = smov [#allocation7]  }
  0x10   :  { %s20_s26 = sshll.u32 %s8517_s25, 4  ;;  %s42_s28 = sshll.u32 %s8518_s27, 4  ;;  %s21_s26 = int_to_ptr.vmem [resolvable:$true] %s20_s26  ;;  %s43_s28 = int_to_ptr.vmem [resolvable:$true] %s42_s28 }
  0x11   :  { %s8434_s29 = scalar_lea.vmem %s21_s26, 9216  ;;  %p8439_p6 = scmp.lt.s32.totalorder %s21_s26, %s21_s26 }
  0x12   :  { %p8435_p5 = scmp.ne.s32.totalorder %s21_s26, %s8434_s29  ;;  %p8440_p7 = scmp.lt.s32.totalorder %s8434_s29, %s8434_s29 }
  0x14   :  { %p8441_p8 = por %p8440_p7, %p8439_p6 }
  0x16   :  { %p8442_p9 = pnand %p8441_p8, %p8435_p5 }
  0x18   :  { %8445 = shalt.err (!%p8442_p9)
}
  0x19   :  { %23 = dma.hbm_to_vmem [thread:$0]  %s8652_s0, 9216, %s21_s26, [#allocation3]  }
  0x1a   :  { %s8454_s7 = scalar_lea.vmem %s43_s28, 16  ;;  %s8458_s1 = scalar_lea.vmem %s43_s28, 32 }
  0x1b   :  { %p8455_p10 = scmp.ne.s32.totalorder %s43_s28, %s8454_s7  ;;  %p8459_p11 = scmp.lt.s32.totalorder %s43_s28, %s43_s28 }
  0x1c   :  { %p8460_p12 = scmp.lt.s32.totalorder %s8458_s1, %s8454_s7 }
  0x1e   :  { %p8461_p13 = por %p8460_p12, %p8459_p11 }
  0x20   :  { %p8462_p0 = pnand %p8461_p13, %p8455_p10 }
  0x22   :  { %8465 = shalt.err (!%p8462_p0)
}
  0x23   :  { %45 = dma.hbm_to_vmem [thread:$0]  %s8654_s2, 16, %s43_s28, [#allocation6]  }
  0x24   :  { %s8519_s10 = smov [#allocation8]  }
  0x25   :  { %s54_s11 = sshll.u32 %s8519_s10, 4  ;;  %s55_s11 = int_to_ptr.vmem [resolvable:$true] %s54_s11 }
  0x26   :  { %s8474_s12 = scalar_lea.vmem %s55_s11, 16  ;;  %s8478_s13 = scalar_lea.vmem %s55_s11, 32 }
  0x27   :  { %p8475_p1 = scmp.ne.s32.totalorder %s55_s11, %s8474_s12  ;;  %p8479_p2 = scmp.lt.s32.totalorder %s55_s11, %s55_s11 }
  0x28   :  { %p8480_p3 = scmp.lt.s32.totalorder %s8478_s13, %s8474_s12 }
  0x2a   :  { %p8481_p4 = por %p8480_p3, %p8479_p2 }
  0x2c   :  { %p8482_p5 = pnand %p8481_p4, %p8475_p1 }
  0x2e   :  { %8485 = shalt.err (!%p8482_p5)
}
  0x2f   :  { %57 = dma.hbm_to_vmem [thread:$0]  %s8656_s4, 16, %s55_s11, [#allocation9]  }
  0x30   :  { %8506 = dma.done.wait [#allocation3], 9216  }
  0x31   :  { %8507 = vsyncadd [#allocation3], 4294958080 }
  0x32   :  { %8508 = dma.done.wait [#allocation6], 73744  }
  0x33   :  { %8509 = vsyncadd [#allocation6], 4294893552 }
  0x34   :  { %8510 = dma.done.wait [#allocation9], 16  }
  0x35   :  { %8511 = vsyncadd [#allocation9], 4294967280  ;;  %v7826_v0 = vld [vmem:[#allocation5 + $0x78] sm:$0xff]   ;;  %v7830_v4 = vld [vmem:[#allocation5 + $0x70] sm:$0xff]   ;;  %vm8521_vm0 = vmmov 0   ;;  %vm6364_vm1 = vcmask 80896  }
  0x36   :  { %v7827_v1 = vld [vmem:[#allocation5 + $0xf8] sm:$0xff]   ;;  %6973 = vmatprep.subr.bf16.mxu0 %v7826_v0  ;;  %v7831_v5 = vld [vmem:[#allocation5 + $0xf0] sm:$0xff]   ;;  %v7834_v8 = vld [vmem:[#allocation5 + $0x68] sm:$0xff]  }
  0x37   :  { %v7828_v2 = vld [vmem:[#allocation5 + $0x38] sm:$0xff]   ;;  %6995 = vmatprep.subr.bf16.mxu1 %v7827_v1  ;;  %v7832_v6 = vld [vmem:[#allocation5 + $0x30] sm:$0xff]   ;;  %v7835_v9 = vld [vmem:[#allocation5 + $0xe8] sm:$0xff]  }
  0x38   :  { %v7829_v3 = vld [vmem:[#allocation5 + $0xb8] sm:$0xff]   ;;  %6974 = vmatpush3.bf16.msra.mxu0 %v7828_v2  ;;  %v7833_v7 = vld [vmem:[#allocation5 + $0xb0] sm:$0xff]   ;;  %v7836_v10 = vld [vmem:[#allocation5 + $0x28] sm:$0xff]  }
  0x39   :  { %6996 = vmatpush3.bf16.msra.mxu1 %v7829_v3  ;;  %6975 = vmatprep.subr.bf16.mxu0 %v7830_v4  ;;  %v7837_v11 = vld [vmem:[#allocation5 + $0xa8] sm:$0xff]   ;;  %v7838_v12 = vld [vmem:[#allocation5 + $0x60] sm:$0xff]   ;;  %v7842_v16 = vld [vmem:[#allocation5 + $0x58] sm:$0xff]  }
  0x3a   :  { %6997 = vmatprep.subr.bf16.mxu1 %v7831_v5  ;;  %v7839_v13 = vld [vmem:[#allocation5 + $0xe0] sm:$0xff]   ;;  %v7843_v17 = vld [vmem:[#allocation5 + $0xd8] sm:$0xff]   ;;  %v7846_v20 = vld [vmem:[#allocation5 + $0x50] sm:$0xff]  }
  0x3b   :  { %v7840_v14 = vld [vmem:[#allocation5 + $0x20] sm:$0xff]   ;;  %v7844_v18 = vld [vmem:[#allocation5 + $0x18] sm:$0xff]   ;;  %v7847_v21 = vld [vmem:[#allocation5 + $0xd0] sm:$0xff]  }
  0x3c   :  { %6976 = vmatpush3.bf16.msra.mxu0 %v7832_v6  ;;  %v7841_v15 = vld [vmem:[#allocation5 + $0xa0] sm:$0xff]   ;;  %v7845_v19 = vld [vmem:[#allocation5 + $0x98] sm:$0xff]   ;;  %v7848_v22 = vld [vmem:[#allocation5 + $0x10] sm:$0xff]  }
  0x3d   :  { %6998 = vmatpush3.bf16.msra.mxu1 %v7833_v7  ;;  %6977 = vmatprep.subr.bf16.mxu0 %v7834_v8  ;;  %v7849_v23 = vld [vmem:[#allocation5 + $0x90] sm:$0xff]   ;;  %v7850_v24 = vld [vmem:[#allocation5 + $0x48] sm:$0xff]   ;;  %v7854_v28 = vld [vmem:[#allocation5 + $0x40] sm:$0xff]  }
  0x3e   :  { %6999 = vmatprep.subr.bf16.mxu1 %v7835_v9  ;;  %v7851_v25 = vld [vmem:[#allocation5 + $0xc8] sm:$0xff]   ;;  %v7855_v29 = vld [vmem:[#allocation5 + $0xc0] sm:$0xff]   ;;  %v74_v33 = vld [vmem:[#allocation2 + $0x18] sm:$0xff] }
  0x3f   :  { %v7852_v26 = vld [vmem:[#allocation5 + $0x8] sm:$0xff]   ;;  %v7856_v30 = vld [vmem:[#allocation5] sm:$0xff]   ;;  %v146_v36 = vpack.c.bf16 %v74_v33, %v74_v33  ;;  %v73_v38 = vld [vmem:[#allocation2 + $0x10] sm:$0xff] }
  0x40   :  { %6978 = vmatpush3.bf16.msra.mxu0 %v7836_v10  ;;  %v7853_v27 = vld [vmem:[#allocation5 + $0x88] sm:$0xff]   ;;  %v7857_v31 = vld [vmem:[#allocation5 + $0x80] sm:$0xff]   ;;  %v145_v39 = vpack.c.bf16 %v73_v38, %v73_v38  ;;  %v7858_v40 = vld [vmem:[#allocation5 + $0x178] sm:$0xff]  }
  0x41   :  { %7000 = vmatpush3.bf16.msra.mxu1 %v7837_v11  ;;  %6979 = vmatprep.subr.bf16.mxu0 %v7838_v12  ;;  %v72_v32 = vld [vmem:[#allocation2 + $0x8] sm:$0xff]  ;;  %v71_v34 = vld [vmem:[#allocation2] sm:$0xff]  ;;  %v7859_v41 = vld [vmem:[#allocation5 + $0x1f8] sm:$0xff]  }
  0x42   :  { %7001 = vmatprep.subr.bf16.mxu1 %v7839_v13  ;;  %v144_v35 = vpack.c.bf16 %v72_v32, %v72_v32  ;;  %v143_v37 = vpack.c.bf16 %v71_v34, %v71_v34  ;;  %4902 = vmatprep.mubr.bf16.mxu1 %v146_v36  ;;  %v7860_v42 = vld [vmem:[#allocation5 + $0x138] sm:$0xff]   ;;  %v7862_v44 = vld [vmem:[#allocation5 + $0x170] sm:$0xff]   ;;  %v7866_v48 = vld [vmem:[#allocation5 + $0x168] sm:$0xff]  }
  0x43   :  { %v7861_v43 = vld [vmem:[#allocation5 + $0x1b8] sm:$0xff]   ;;  %v7863_v45 = vld [vmem:[#allocation5 + $0x1f0] sm:$0xff]   ;;  %v7867_v49 = vld [vmem:[#allocation5 + $0x1e8] sm:$0xff]  }
  0x44   :  { %6980 = vmatpush3.bf16.msra.mxu0 %v7840_v14  ;;  %4862 = vmatprep.mubr.bf16.mxu0 %v144_v35  ;;  %v7864_v46 = vld [vmem:[#allocation5 + $0x130] sm:$0xff]   ;;  %v7868_v50 = vld [vmem:[#allocation5 + $0x128] sm:$0xff]   ;;  %v7870_v52 = vld [vmem:[#allocation5 + $0x160] sm:$0xff]  }
  0x45   :  { %7002 = vmatpush3.bf16.msra.mxu1 %v7841_v15  ;;  %6981 = vmatprep.subr.bf16.mxu0 %v7842_v16  ;;  %v7865_v47 = vld [vmem:[#allocation5 + $0x1b0] sm:$0xff]   ;;  %v7869_v51 = vld [vmem:[#allocation5 + $0x1a8] sm:$0xff]   ;;  %v7871_v53 = vld [vmem:[#allocation5 + $0x1e0] sm:$0xff]  }
  0x46   :  { %7003 = vmatprep.subr.bf16.mxu1 %v7843_v17  ;;  %v7872_v54 = vld [vmem:[#allocation5 + $0x120] sm:$0xff]   ;;  %v7874_v56 = vld [vmem:[#allocation5 + $0x158] sm:$0xff]   ;;  %v7878_v60 = vld [vmem:[#allocation5 + $0x150] sm:$0xff]  }
  0x47   :  { %v7873_v55 = vld [vmem:[#allocation5 + $0x1a0] sm:$0xff]   ;;  %v7875_v57 = vld [vmem:[#allocation5 + $0x1d8] sm:$0xff]   ;;  %v7879_v61 = vld [vmem:[#allocation5 + $0x1d0] sm:$0xff]  }
  0x48   :  { %6982 = vmatpush3.bf16.msra.mxu0 %v7844_v18  ;;  %v7876_v58 = vld [vmem:[#allocation5 + $0x118] sm:$0xff]   ;;  %v7880_v62 = vld [vmem:[#allocation5 + $0x110] sm:$0xff]   ;;  %v7882_v0 = vld [vmem:[#allocation5 + $0x148] sm:$0xff]  }
  0x49   :  { %7004 = vmatpush3.bf16.msra.mxu1 %v7845_v19  ;;  %6983 = vmatprep.subr.bf16.mxu0 %v7846_v20  ;;  %v7877_v59 = vld [vmem:[#allocation5 + $0x198] sm:$0xff]   ;;  %v7881_v63 = vld [vmem:[#allocation5 + $0x190] sm:$0xff]   ;;  %v7883_v1 = vld [vmem:[#allocation5 + $0x1c8] sm:$0xff]  }
  0x4a   :  { %7005 = vmatprep.subr.bf16.mxu1 %v7847_v21  ;;  %v7884_v2 = vld [vmem:[#allocation5 + $0x108] sm:$0xff]   ;;  %v7886_v4 = vld [vmem:[#allocation5 + $0x140] sm:$0xff]   ;;  %v78_v9 = vld [vmem:[#allocation2 + $0x38] sm:$0xff] }
  0x4b   :  { %v7885_v3 = vld [vmem:[#allocation5 + $0x188] sm:$0xff]   ;;  %v7887_v5 = vld [vmem:[#allocation5 + $0x1c0] sm:$0xff]   ;;  %v150_v11 = vpack.c.bf16 %v78_v9, %v78_v9  ;;  %v77_v13 = vld [vmem:[#allocation2 + $0x30] sm:$0xff] }
  0x4c   :  { %6984 = vmatpush3.bf16.msra.mxu0 %v7848_v22  ;;  %v7888_v6 = vld [vmem:[#allocation5 + $0x100] sm:$0xff]   ;;  %v76_v8 = vld [vmem:[#allocation2 + $0x28] sm:$0xff]  ;;  %v149_v15 = vpack.c.bf16 %v77_v13, %v77_v13  ;;  %v7890_v16 = vld [vmem:[#allocation5 + $0x278] sm:$0xff]  }
  0x4d   :  { %7006 = vmatpush3.bf16.msra.mxu1 %v7849_v23  ;;  %6985 = vmatprep.subr.bf16.mxu0 %v7850_v24  ;;  %v7889_v7 = vld [vmem:[#allocation5 + $0x180] sm:$0xff]   ;;  %v148_v10 = vpack.c.bf16 %v76_v8, %v76_v8  ;;  %v7891_v17 = vld [vmem:[#allocation5 + $0x2f8] sm:$0xff]   ;;  %v7894_v20 = vld [vmem:[#allocation5 + $0x270] sm:$0xff]  }
  0x4e   :  { %7007 = vmatprep.subr.bf16.mxu1 %v7851_v25  ;;  %v75_v12 = vld [vmem:[#allocation2 + $0x20] sm:$0xff]  ;;  %v7892_v18 = vld [vmem:[#allocation5 + $0x238] sm:$0xff]   ;;  %v7895_v21 = vld [vmem:[#allocation5 + $0x2f0] sm:$0xff]  }
  0x4f   :  { %v147_v14 = vpack.c.bf16 %v75_v12, %v75_v12  ;;  %v7893_v19 = vld [vmem:[#allocation5 + $0x2b8] sm:$0xff]   ;;  %v7896_v22 = vld [vmem:[#allocation5 + $0x230] sm:$0xff]   ;;  %v7898_v24 = vld [vmem:[#allocation5 + $0x268] sm:$0xff]  }
  0x50   :  { %6986 = vmatpush3.bf16.msra.mxu0 %v7852_v26  ;;  %v7897_v23 = vld [vmem:[#allocation5 + $0x2b0] sm:$0xff]   ;;  %v7899_v25 = vld [vmem:[#allocation5 + $0x2e8] sm:$0xff]   ;;  %v7906_v32 = vld [vmem:[#allocation5 + $0x258] sm:$0xff]  }
  0x51   :  { %7008 = vmatpush3.bf16.msra.mxu1 %v7853_v27  ;;  %6987 = vmatprep.subr.bf16.mxu0 %v7854_v28  ;;  %v7900_v26 = vld [vmem:[#allocation5 + $0x228] sm:$0xff]   ;;  %v7902_v28 = vld [vmem:[#allocation5 + $0x260] sm:$0xff]   ;;  %v7907_v33 = vld [vmem:[#allocation5 + $0x2d8] sm:$0xff]  }
  0x52   :  { %7009 = vmatprep.subr.bf16.mxu1 %v7855_v29  ;;  %v7901_v27 = vld [vmem:[#allocation5 + $0x2a8] sm:$0xff]   ;;  %v7903_v29 = vld [vmem:[#allocation5 + $0x2e0] sm:$0xff]   ;;  %v7908_v34 = vld [vmem:[#allocation5 + $0x218] sm:$0xff]  }
  0x53   :  { %v7909_v35 = vld [vmem:[#allocation5 + $0x298] sm:$0xff]   ;;  %v7910_v36 = vld [vmem:[#allocation5 + $0x250] sm:$0xff]  }
  0x54   :  { %6988 = vmatpush3.bf16.msra.mxu0 %v7856_v30  ;;  %v7904_v30 = vld [vmem:[#allocation5 + $0x220] sm:$0xff]   ;;  %v7912_v38 = vld [vmem:[#allocation5 + $0x210] sm:$0xff]   ;;  %v7938_v8 = vld [vmem:[#allocation5 + $0x358] sm:$0xff]  }
  0x55   :  { %7010 = vmatpush3.bf16.msra.mxu1 %v7857_v31  ;;  %7017 = vmatprep.subr.bf16.mxu0 %v7858_v40  ;;  %v7905_v31 = vld [vmem:[#allocation5 + $0x2a0] sm:$0xff]   ;;  %v7914_v40 = vld [vmem:[#allocation5 + $0x248] sm:$0xff]   ;;  %v7939_v9 = vld [vmem:[#allocation5 + $0x3d8] sm:$0xff]  }
  0x56   :  { %7039 = vmatprep.subr.bf16.mxu1 %v7859_v41  ;;  %v7915_v41 = vld [vmem:[#allocation5 + $0x2c8] sm:$0xff]   ;;  %v7942_v12 = vld [vmem:[#allocation5 + $0x350] sm:$0xff]  }
  0x57   :  { %4863 = vmatmul.mubr.bf16.vlgmr.msra.gmra.mxu0 %v143_v37  ;;  %v7911_v37 = vld [vmem:[#allocation5 + $0x2d0] sm:$0xff]  }
  0x58   :  { %4903 = vmatmul.mubr.bf16.vlgmr.msra.gmra.mxu1 %v145_v39  ;;  %7018 = vmatpush3.bf16.msra.mxu0 %v7860_v42  ;;  %v7913_v39 = vld [vmem:[#allocation5 + $0x290] sm:$0xff]   ;;  %v7916_v42 = vld [vmem:[#allocation5 + $0x208] sm:$0xff]  }
  0x59   :  { %7040 = vmatpush3.bf16.msra.mxu1 %v7861_v43  ;;  %7019 = vmatprep.subr.bf16.mxu0 %v7862_v44  ;;  %v7917_v43 = vld [vmem:[#allocation5 + $0x288] sm:$0xff]   ;;  %v7918_v44 = vld [vmem:[#allocation5 + $0x240] sm:$0xff]   ;;  %v7943_v13 = vld [vmem:[#allocation5 + $0x3d0] sm:$0xff]  }
  0x5a   :  { %7041 = vmatprep.subr.bf16.mxu1 %v7863_v45  ;;  %4942 = vmatprep.mubr.bf16.mxu0 %v148_v10  ;;  %v7919_v45 = vld [vmem:[#allocation5 + $0x2c0] sm:$0xff]   ;;  %v7940_v10 = vld [vmem:[#allocation5 + $0x318] sm:$0xff]  }
  0x5b   :  { %4982 = vmatprep.mubr.bf16.mxu1 %v150_v11  ;;  %v7941_v11 = vld [vmem:[#allocation5 + $0x398] sm:$0xff]  }
  0x5c   :  { %7020 = vmatpush3.bf16.msra.mxu0 %v7864_v46  ;;  %v7920_v46 = vld [vmem:[#allocation5 + $0x200] sm:$0xff]  }
  0x5d   :  { %7042 = vmatpush3.bf16.msra.mxu1 %v7865_v47  ;;  %7021 = vmatprep.subr.bf16.mxu0 %v7866_v48  ;;  %v7921_v47 = vld [vmem:[#allocation5 + $0x280] sm:$0xff]   ;;  %v80_v48 = vld [vmem:[#allocation2 + $0x48] sm:$0xff] }
  0x5e   :  { %7043 = vmatprep.subr.bf16.mxu1 %v7867_v49  ;;  %v152_v49 = vpack.c.bf16 %v80_v48, %v80_v48  ;;  %v7970_v48 = vld [vmem:[#allocation5 + $0x458] sm:$0xff]  }
  0x60   :  { %7022 = vmatpush3.bf16.msra.mxu0 %v7868_v50  ;;  %v82_v50 = vld [vmem:[#allocation2 + $0x58] sm:$0xff] }
  0x61   :  { %7044 = vmatpush3.bf16.msra.mxu1 %v7869_v51  ;;  %7023 = vmatprep.subr.bf16.mxu0 %v7870_v52  ;;  %v79_v51 = vld [vmem:[#allocation2 + $0x40] sm:$0xff]  ;;  %v81_v52 = vld [vmem:[#allocation2 + $0x50] sm:$0xff] }
  0x62   :  { %7045 = vmatprep.subr.bf16.mxu1 %v7871_v53  ;;  %v154_v53 = vpack.c.bf16 %v82_v50, %v82_v50  ;;  %v7972_v50 = vld [vmem:[#allocation5 + $0x418] sm:$0xff]  }
  0x64   :  { %7024 = vmatpush3.bf16.msra.mxu0 %v7872_v54  ;;  %v151_v54 = vpack.c.bf16 %v79_v51, %v79_v51  ;;  %v7973_v51 = vld [vmem:[#allocation5 + $0x498] sm:$0xff]  }
  0x65   :  { %7046 = vmatpush3.bf16.msra.mxu1 %v7873_v55  ;;  %7025 = vmatprep.subr.bf16.mxu0 %v7874_v56  ;;  %v153_v55 = vpack.c.bf16 %v81_v52, %v81_v52  ;;  %v7922_v56 = vld [vmem:[#allocation5 + $0x378] sm:$0xff]   ;;  %v7974_v52 = vld [vmem:[#allocation5 + $0x450] sm:$0xff]  }
  0x66   :  { %7047 = vmatprep.subr.bf16.mxu1 %v7875_v57  ;;  %v7923_v57 = vld [vmem:[#allocation5 + $0x3f8] sm:$0xff]  }
  0x68   :  { %7026 = vmatpush3.bf16.msra.mxu0 %v7876_v58  ;;  %v7924_v58 = vld [vmem:[#allocation5 + $0x338] sm:$0xff]  }
  0x69   :  { %7048 = vmatpush3.bf16.msra.mxu1 %v7877_v59  ;;  %7027 = vmatprep.subr.bf16.mxu0 %v7878_v60  ;;  %v7925_v59 = vld [vmem:[#allocation5 + $0x3b8] sm:$0xff]   ;;  %v7926_v60 = vld [vmem:[#allocation5 + $0x370] sm:$0xff]  }
  0x6a   :  { %7049 = vmatprep.subr.bf16.mxu1 %v7879_v61  ;;  %v7927_v61 = vld [vmem:[#allocation5 + $0x3f0] sm:$0xff]  }
  0x6c   :  { %7028 = vmatpush3.bf16.msra.mxu0 %v7880_v62  ;;  %v7928_v62 = vld [vmem:[#allocation5 + $0x330] sm:$0xff]  }
  0x6d   :  { %7050 = vmatpush3.bf16.msra.mxu1 %v7881_v63  ;;  %7029 = vmatprep.subr.bf16.mxu0 %v7882_v0  ;;  %v7929_v63 = vld [vmem:[#allocation5 + $0x3b0] sm:$0xff]   ;;  %v7930_v0 = vld [vmem:[#allocation5 + $0x368] sm:$0xff]  }
  0x6e   :  { %7051 = vmatprep.subr.bf16.mxu1 %v7883_v1  ;;  %v7931_v1 = vld [vmem:[#allocation5 + $0x3e8] sm:$0xff]  }
  0x70   :  { %7030 = vmatpush3.bf16.msra.mxu0 %v7884_v2  ;;  %v7932_v2 = vld [vmem:[#allocation5 + $0x328] sm:$0xff]  }
  0x71   :  { %7052 = vmatpush3.bf16.msra.mxu1 %v7885_v3  ;;  %7031 = vmatprep.subr.bf16.mxu0 %v7886_v4  ;;  %v7933_v3 = vld [vmem:[#allocation5 + $0x3a8] sm:$0xff]   ;;  %v7934_v4 = vld [vmem:[#allocation5 + $0x360] sm:$0xff]  }
  0x72   :  { %7053 = vmatprep.subr.bf16.mxu1 %v7887_v5  ;;  %v7935_v5 = vld [vmem:[#allocation5 + $0x3e0] sm:$0xff]  }
  0x74   :  { %7032 = vmatpush3.bf16.msra.mxu0 %v7888_v6  ;;  %v7936_v6 = vld [vmem:[#allocation5 + $0x320] sm:$0xff]  }
  0x75   :  { %7054 = vmatpush3.bf16.msra.mxu1 %v7889_v7  ;;  %7061 = vmatprep.subr.bf16.mxu0 %v7890_v16  ;;  %v7937_v7 = vld [vmem:[#allocation5 + $0x3a0] sm:$0xff]   ;;  %v7946_v16 = vld [vmem:[#allocation5 + $0x348] sm:$0xff]  }
  0x76   :  { %7083 = vmatprep.subr.bf16.mxu1 %v7891_v17  ;;  %v7947_v17 = vld [vmem:[#allocation5 + $0x3c8] sm:$0xff]  }
  0x77   :  { %4943 = vmatmul.mubr.bf16.vlgmr.msra.gmra.mxu0 %v147_v14  ;;  %v7944_v14 = vld [vmem:[#allocation5 + $0x310] sm:$0xff]  }
  0x78   :  { %4983 = vmatmul.mubr.bf16.vlgmr.msra.gmra.mxu1 %v149_v15  ;;  %7062 = vmatpush3.bf16.msra.mxu0 %v7892_v18  ;;  %v7945_v15 = vld [vmem:[#allocation5 + $0x390] sm:$0xff]   ;;  %v7948_v18 = vld [vmem:[#allocation5 + $0x308] sm:$0xff]  }
  0x79   :  { %7084 = vmatpush3.bf16.msra.mxu1 %v7893_v19  ;;  %7063 = vmatprep.subr.bf16.mxu0 %v7894_v20  ;;  %v7949_v19 = vld [vmem:[#allocation5 + $0x388] sm:$0xff]   ;;  %v7950_v20 = vld [vmem:[#allocation5 + $0x340] sm:$0xff]  }
  0x7a   :  { %7085 = vmatprep.subr.bf16.mxu1 %v7895_v21  ;;  %5022 = vmatprep.mubr.bf16.mxu0 %v152_v49  ;;  %v7951_v21 = vld [vmem:[#allocation5 + $0x3c0] sm:$0xff]   ;;  %v7971_v49 = vld [vmem:[#allocation5 + $0x4d8] sm:$0xff]  }
  0x7b   :  { %5062 = vmatprep.mubr.bf16.mxu1 %v154_v53  ;;  %v7975_v53 = vld [vmem:[#allocation5 + $0x4d0] sm:$0xff]  }
  0x7c   :  { %7064 = vmatpush3.bf16.msra.mxu0 %v7896_v22  ;;  %v7952_v22 = vld [vmem:[#allocation5 + $0x300] sm:$0xff]  }
  0x7d   :  { %7086 = vmatpush3.bf16.msra.mxu1 %v7897_v23  ;;  %7065 = vmatprep.subr.bf16.mxu0 %v7898_v24  ;;  %v7953_v23 = vld [vmem:[#allocation5 + $0x380] sm:$0xff]   ;;  %v84_v24 = vld [vmem:[#allocation2 + $0x68] sm:$0xff] }
  0x7e   :  { %7087 = vmatprep.subr.bf16.mxu1 %v7899_v25  ;;  %v86_v25 = vld [vmem:[#allocation2 + $0x78] sm:$0xff] }
  0x80   :  { %7066 = vmatpush3.bf16.msra.mxu0 %v7900_v26  ;;  %v83_v26 = vld [vmem:[#allocation2 + $0x60] sm:$0xff] }
  0x81   :  { %7088 = vmatpush3.bf16.msra.mxu1 %v7901_v27  ;;  %7067 = vmatprep.subr.bf16.mxu0 %v7902_v28  ;;  %v156_v27 = vpack.c.bf16 %v84_v24, %v84_v24  ;;  %v158_v28 = vpack.c.bf16 %v86_v25, %v86_v25  ;;  %v8002_v24 = vld [vmem:[#allocation5 + $0x558] sm:$0xff]  }
  0x82   :  { %7089 = vmatprep.subr.bf16.mxu1 %v7903_v29  ;;  %v155_v29 = vpack.c.bf16 %v83_v26, %v83_v26  ;;  %v8003_v25 = vld [vmem:[#allocation5 + $0x5d8] sm:$0xff]  }
  0x83   :  { %v8004_v26 = vld [vmem:[#allocation5 + $0x518] sm:$0xff]  }
  0x84   :  { %7068 = vmatpush3.bf16.msra.mxu0 %v7904_v30  ;;  %v85_v30 = vld [vmem:[#allocation2 + $0x70] sm:$0xff] }
  0x85   :  { %7090 = vmatpush3.bf16.msra.mxu1 %v7905_v31  ;;  %7069 = vmatprep.subr.bf16.mxu0 %v7906_v32  ;;  %v157_v31 = vpack.c.bf16 %v85_v30, %v85_v30  ;;  %v7954_v32 = vld [vmem:[#allocation5 + $0x478] sm:$0xff]   ;;  %v8008_v30 = vld [vmem:[#allocation5 + $0x510] sm:$0xff]  }
  0x86   :  { %7091 = vmatprep.subr.bf16.mxu1 %v7907_v33  ;;  %v7955_v33 = vld [vmem:[#allocation5 + $0x4f8] sm:$0xff]  }
  0x88   :  { %7070 = vmatpush3.bf16.msra.mxu0 %v7908_v34  ;;  %v7956_v34 = vld [vmem:[#allocation5 + $0x438] sm:$0xff]  }
  0x89   :  { %7092 = vmatpush3.bf16.msra.mxu1 %v7909_v35  ;;  %7071 = vmatprep.subr.bf16.mxu0 %v7910_v36  ;;  %v7957_v35 = vld [vmem:[#allocation5 + $0x4b8] sm:$0xff]   ;;  %v7958_v36 = vld [vmem:[#allocation5 + $0x470] sm:$0xff]  }
  0x8a   :  { %7093 = vmatprep.subr.bf16.mxu1 %v7911_v37  ;;  %v7959_v37 = vld [vmem:[#allocation5 + $0x4f0] sm:$0xff]  }
  0x8c   :  { %7072 = vmatpush3.bf16.msra.mxu0 %v7912_v38  ;;  %v7960_v38 = vld [vmem:[#allocation5 + $0x430] sm:$0xff]  }
  0x8d   :  { %7094 = vmatpush3.bf16.msra.mxu1 %v7913_v39  ;;  %7073 = vmatprep.subr.bf16.mxu0 %v7914_v40  ;;  %v7961_v39 = vld [vmem:[#allocation5 + $0x4b0] sm:$0xff]   ;;  %v7962_v40 = vld [vmem:[#allocation5 + $0x468] sm:$0xff]  }
  0x8e   :  { %7095 = vmatprep.subr.bf16.mxu1 %v7915_v41  ;;  %v7963_v41 = vld [vmem:[#allocation5 + $0x4e8] sm:$0xff]  }
  0x90   :  { %7074 = vmatpush3.bf16.msra.mxu0 %v7916_v42  ;;  %v7964_v42 = vld [vmem:[#allocation5 + $0x428] sm:$0xff]  }
  0x91   :  { %7096 = vmatpush3.bf16.msra.mxu1 %v7917_v43  ;;  %7075 = vmatprep.subr.bf16.mxu0 %v7918_v44  ;;  %v7965_v43 = vld [vmem:[#allocation5 + $0x4a8] sm:$0xff]   ;;  %v7966_v44 = vld [vmem:[#allocation5 + $0x460] sm:$0xff]  }
  0x92   :  { %7097 = vmatprep.subr.bf16.mxu1 %v7919_v45  ;;  %v7967_v45 = vld [vmem:[#allocation5 + $0x4e0] sm:$0xff]  }
  0x94   :  { %7076 = vmatpush3.bf16.msra.mxu0 %v7920_v46  ;;  %v7968_v46 = vld [vmem:[#allocation5 + $0x420] sm:$0xff]  }
  0x95   :  { %7098 = vmatpush3.bf16.msra.mxu1 %v7921_v47  ;;  %7105 = vmatprep.subr.bf16.mxu0 %v7922_v56  ;;  %v7969_v47 = vld [vmem:[#allocation5 + $0x4a0] sm:$0xff]   ;;  %v7978_v56 = vld [vmem:[#allocation5 + $0x448] sm:$0xff]  }
  0x96   :  { %7127 = vmatprep.subr.bf16.mxu1 %v7923_v57  ;;  %v7979_v57 = vld [vmem:[#allocation5 + $0x4c8] sm:$0xff]  }
  0x97   :  { %5023 = vmatmul.mubr.bf16.vlgmr.msra.gmra.mxu0 %v151_v54  ;;  %v7976_v54 = vld [vmem:[#allocation5 + $0x410] sm:$0xff]  }
  0x98   :  { %5063 = vmatmul.mubr.bf16.vlgmr.msra.gmra.mxu1 %v153_v55  ;;  %7106 = vmatpush3.bf16.msra.mxu0 %v7924_v58  ;;  %v7977_v55 = vld [vmem:[#allocation5 + $0x490] sm:$0xff]   ;;  %v7980_v58 = vld [vmem:[#allocation5 + $0x408] sm:$0xff]  }
  0x99   :  { %7128 = vmatpush3.bf16.msra.mxu1 %v7925_v59  ;;  %7107 = vmatprep.subr.bf16.mxu0 %v7926_v60  ;;  %v7981_v59 = vld [vmem:[#allocation5 + $0x488] sm:$0xff]   ;;  %v7982_v60 = vld [vmem:[#allocation5 + $0x440] sm:$0xff]  }
  0x9a   :  { %7129 = vmatprep.subr.bf16.mxu1 %v7927_v61  ;;  %5102 = vmatprep.mubr.bf16.mxu0 %v156_v27  ;;  %v7983_v61 = vld [vmem:[#allocation5 + $0x4c0] sm:$0xff]   ;;  %v8005_v27 = vld [vmem:[#allocation5 + $0x598] sm:$0xff]  }
  0x9b   :  { %5142 = vmatprep.mubr.bf16.mxu1 %v158_v28  ;;  %v8006_v28 = vld [vmem:[#allocation5 + $0x550] sm:$0xff]  }
  0x9c   :  { %7108 = vmatpush3.bf16.msra.mxu0 %v7928_v62  ;;  %v7984_v62 = vld [vmem:[#allocation5 + $0x400] sm:$0xff]  }
  0x9d   :  { %7130 = vmatpush3.bf16.msra.mxu1 %v7929_v63  ;;  %7109 = vmatprep.subr.bf16.mxu0 %v7930_v0  ;;  %v7985_v63 = vld [vmem:[#allocation5 + $0x480] sm:$0xff]   ;;  %v88_v0 = vld [vmem:[#allocation2 + $0x88] sm:$0xff] }
  0x9e   :  { %7131 = vmatprep.subr.bf16.mxu1 %v7931_v1  ;;  %v90_v1 = vld [vmem:[#allocation2 + $0x98] sm:$0xff] }
  0xa0   :  { %7110 = vmatpush3.bf16.msra.mxu0 %v7932_v2  ;;  %v160_v2 = vpack.c.bf16 %v88_v0, %v88_v0  ;;  %v8034_v0 = vld [vmem:[#allocation5 + $0x658] sm:$0xff]  }
  0xa1   :  { %7132 = vmatpush3.bf16.msra.mxu1 %v7933_v3  ;;  %7111 = vmatprep.subr.bf16.mxu0 %v7934_v4  ;;  %v162_v3 = vpack.c.bf16 %v90_v1, %v90_v1  ;;  %v87_v4 = vld [vmem:[#allocation2 + $0x80] sm:$0xff]  ;;  %v8035_v1 = vld [vmem:[#allocation5 + $0x6d8] sm:$0xff]  }
  0xa2   :  { %7133 = vmatprep.subr.bf16.mxu1 %v7935_v5  ;;  %v89_v5 = vld [vmem:[#allocation2 + $0x90] sm:$0xff] }
  0xa4   :  { %7112 = vmatpush3.bf16.msra.mxu0 %v7936_v6  ;;  %v159_v6 = vpack.c.bf16 %v87_v4, %v87_v4  ;;  %v8038_v4 = vld [vmem:[#allocation5 + $0x650] sm:$0xff]  }
  0xa5   :  { %7134 = vmatpush3.bf16.msra.mxu1 %v7937_v7  ;;  %7113 = vmatprep.subr.bf16.mxu0 %v7938_v8  ;;  %v161_v7 = vpack.c.bf16 %v89_v5, %v89_v5  ;;  %v7986_v8 = vld [vmem:[#allocation5 + $0x578] sm:$0xff]   ;;  %v8039_v5 = vld [vmem:[#allocation5 + $0x6d0] sm:$0xff]  }
  0xa6   :  { %7135 = vmatprep.subr.bf16.mxu1 %v7939_v9  ;;  %v7987_v9 = vld [vmem:[#allocation5 + $0x5f8] sm:$0xff]  }
  0xa8   :  { %7114 = vmatpush3.bf16.msra.mxu0 %v7940_v10  ;;  %v7988_v10 = vld [vmem:[#allocation5 + $0x538] sm:$0xff]  }
  0xa9   :  { %7136 = vmatpush3.bf16.msra.mxu1 %v7941_v11  ;;  %7115 = vmatprep.subr.bf16.mxu0 %v7942_v12  ;;  %v7989_v11 = vld [vmem:[#allocation5 + $0x5b8] sm:$0xff]   ;;  %v7990_v12 = vld [vmem:[#allocation5 + $0x570] sm:$0xff]  }
  0xaa   :  { %7137 = vmatprep.subr.bf16.mxu1 %v7943_v13  ;;  %v7991_v13 = vld [vmem:[#allocation5 + $0x5f0] sm:$0xff]  }
  0xac   :  { %7116 = vmatpush3.bf16.msra.mxu0 %v7944_v14  ;;  %v7992_v14 = vld [vmem:[#allocation5 + $0x530] sm:$0xff]  }
  0xad   :  { %7138 = vmatpush3.bf16.msra.mxu1 %v7945_v15  ;;  %7117 = vmatprep.subr.bf16.mxu0 %v7946_v16  ;;  %v7993_v15 = vld [vmem:[#allocation5 + $0x5b0] sm:$0xff]   ;;  %v7994_v16 = vld [vmem:[#allocation5 + $0x568] sm:$0xff]  }
  0xae   :  { %7139 = vmatprep.subr.bf16.mxu1 %v7947_v17  ;;  %v7995_v17 = vld [vmem:[#allocation5 + $0x5e8] sm:$0xff]  }
  0xb0   :  { %7118 = vmatpush3.bf16.msra.mxu0 %v7948_v18  ;;  %v7996_v18 = vld [vmem:[#allocation5 + $0x528] sm:$0xff]  }
  0xb1   :  { %7140 = vmatpush3.bf16.msra.mxu1 %v7949_v19  ;;  %7119 = vmatprep.subr.bf16.mxu0 %v7950_v20  ;;  %v7997_v19 = vld [vmem:[#allocation5 + $0x5a8] sm:$0xff]   ;;  %v7998_v20 = vld [vmem:[#allocation5 + $0x560] sm:$0xff]  }
  0xb2   :  { %7141 = vmatprep.subr.bf16.mxu1 %v7951_v21  ;;  %v7999_v21 = vld [vmem:[#allocation5 + $0x5e0] sm:$0xff]  }
  0xb4   :  { %7120 = vmatpush3.bf16.msra.mxu0 %v7952_v22  ;;  %v8000_v22 = vld [vmem:[#allocation5 + $0x520] sm:$0xff]  }
  0xb5   :  { %7142 = vmatpush3.bf16.msra.mxu1 %v7953_v23  ;;  %7149 = vmatprep.subr.bf16.mxu0 %v7954_v32  ;;  %v8001_v23 = vld [vmem:[#allocation5 + $0x5a0] sm:$0xff]   ;;  %v8010_v32 = vld [vmem:[#allocation5 + $0x548] sm:$0xff]  }
  0xb6   :  { %7171 = vmatprep.subr.bf16.mxu1 %v7955_v33  ;;  %v8011_v33 = vld [vmem:[#allocation5 + $0x5c8] sm:$0xff]  }
  0xb7   :  { %5103 = vmatmul.mubr.bf16.vlgmr.msra.gmra.mxu0 %v155_v29  ;;  %v8007_v29 = vld [vmem:[#allocation5 + $0x5d0] sm:$0xff]  }
  0xb8   :  { %5143 = vmatmul.mubr.bf16.vlgmr.msra.gmra.mxu1 %v157_v31  ;;  %7150 = vmatpush3.bf16.msra.mxu0 %v7956_v34  ;;  %v8009_v31 = vld [vmem:[#allocation5 + $0x590] sm:$0xff]   ;;  %v8012_v34 = vld [vmem:[#allocation5 + $0x508] sm:$0xff]  }
  0xb9   :  { %7172 = vmatpush3.bf16.msra.mxu1 %v7957_v35  ;;  %7151 = vmatprep.subr.bf16.mxu0 %v7958_v36  ;;  %v8013_v35 = vld [vmem:[#allocation5 + $0x588] sm:$0xff]   ;;  %v8014_v36 = vld [vmem:[#allocation5 + $0x540] sm:$0xff]  }
  0xba   :  { %7173 = vmatprep.subr.bf16.mxu1 %v7959_v37  ;;  %5182 = vmatprep.mubr.bf16.mxu0 %v160_v2  ;;  %v8015_v37 = vld [vmem:[#allocation5 + $0x5c0] sm:$0xff]   ;;  %v8036_v2 = vld [vmem:[#allocation5 + $0x618] sm:$0xff]  }
  0xbb   :  { %5222 = vmatprep.mubr.bf16.mxu1 %v162_v3  ;;  %v8037_v3 = vld [vmem:[#allocation5 + $0x698] sm:$0xff]  }
  0xbc   :  { %7152 = vmatpush3.bf16.msra.mxu0 %v7960_v38  ;;  %v8016_v38 = vld [vmem:[#allocation5 + $0x500] sm:$0xff]  }
  0xbd   :  { %7174 = vmatpush3.bf16.msra.mxu1 %v7961_v39  ;;  %7153 = vmatprep.subr.bf16.mxu0 %v7962_v40  ;;  %v8017_v39 = vld [vmem:[#allocation5 + $0x580] sm:$0xff]   ;;  %v92_v40 = vld [vmem:[#allocation2 + $0xa8] sm:$0xff] }
  0xbe   :  { %7175 = vmatprep.subr.bf16.mxu1 %v7963_v41  ;;  %v164_v41 = vpack.c.bf16 %v92_v40, %v92_v40  ;;  %v8054_v40 = vld [vmem:[#allocation5 + $0x770] sm:$0xff]  }
  0xc0   :  { %7154 = vmatpush3.bf16.msra.mxu0 %v7964_v42  ;;  %v94_v42 = vld [vmem:[#allocation2 + $0xb8] sm:$0xff] }
  0xc1   :  { %7176 = vmatpush3.bf16.msra.mxu1 %v7965_v43  ;;  %7155 = vmatprep.subr.bf16.mxu0 %v7966_v44  ;;  %v91_v43 = vld [vmem:[#allocation2 + $0xa0] sm:$0xff]  ;;  %v93_v44 = vld [vmem:[#allocation2 + $0xb0] sm:$0xff] }
  0xc2   :  { %7177 = vmatprep.subr.bf16.mxu1 %v7967_v45  ;;  %v166_v45 = vpack.c.bf16 %v94_v42, %v94_v42 }
  0xc4   :  { %7156 = vmatpush3.bf16.msra.mxu0 %v7968_v46  ;;  %v163_v46 = vpack.c.bf16 %v91_v43, %v91_v43  ;;  %v8056_v43 = vld [vmem:[#allocation5 + $0x730] sm:$0xff]  }
  0xc5   :  { %7178 = vmatpush3.bf16.msra.mxu1 %v7969_v47  ;;  %7157 = vmatprep.subr.bf16.mxu0 %v7970_v48  ;;  %v165_v47 = vpack.c.bf16 %v93_v44, %v93_v44  ;;  %v8018_v48 = vld [vmem:[#allocation5 + $0x678] sm:$0xff]   ;;  %v8057_v44 = vld [vmem:[#allocation5 + $0x7b0] sm:$0xff]  }
  0xc6   :  { %7179 = vmatprep.subr.bf16.mxu1 %v7971_v49  ;;  %v8019_v49 = vld [vmem:[#allocation5 + $0x6f8] sm:$0xff]  }
  0xc8   :  { %7158 = vmatpush3.bf16.msra.mxu0 %v7972_v50  ;;  %v8020_v50 = vld [vmem:[#allocation5 + $0x638] sm:$0xff]  }
  0xc9   :  { %7180 = vmatpush3.bf16.msra.mxu1 %v7973_v51  ;;  %7159 = vmatprep.subr.bf16.mxu0 %v7974_v52  ;;  %v8021_v51 = vld [vmem:[#allocation5 + $0x6b8] sm:$0xff]   ;;  %v8022_v52 = vld [vmem:[#allocation5 + $0x670] sm:$0xff]  }
  0xca   :  { %7181 = vmatprep.subr.bf16.mxu1 %v7975_v53  ;;  %v8023_v53 = vld [vmem:[#allocation5 + $0x6f0] sm:$0xff]  }
  0xcc   :  { %7160 = vmatpush3.bf16.msra.mxu0 %v7976_v54  ;;  %v8024_v54 = vld [vmem:[#allocation5 + $0x630] sm:$0xff]  }
  0xcd   :  { %7182 = vmatpush3.bf16.msra.mxu1 %v7977_v55  ;;  %7161 = vmatprep.subr.bf16.mxu0 %v7978_v56  ;;  %v8025_v55 = vld [vmem:[#allocation5 + $0x6b0] sm:$0xff]   ;;  %v8026_v56 = vld [vmem:[#allocation5 + $0x668] sm:$0xff]  }
  0xce   :  { %7183 = vmatprep.subr.bf16.mxu1 %v7979_v57  ;;  %v8027_v57 = vld [vmem:[#allocation5 + $0x6e8] sm:$0xff]  }
  0xd0   :  { %7162 = vmatpush3.bf16.msra.mxu0 %v7980_v58  ;;  %v8028_v58 = vld [vmem:[#allocation5 + $0x628] sm:$0xff]  }
  0xd1   :  { %7184 = vmatpush3.bf16.msra.mxu1 %v7981_v59  ;;  %7163 = vmatprep.subr.bf16.mxu0 %v7982_v60  ;;  %v8029_v59 = vld [vmem:[#allocation5 + $0x6a8] sm:$0xff]   ;;  %v8030_v60 = vld [vmem:[#allocation5 + $0x660] sm:$0xff]  }
  0xd2   :  { %7185 = vmatprep.subr.bf16.mxu1 %v7983_v61  ;;  %v8031_v61 = vld [vmem:[#allocation5 + $0x6e0] sm:$0xff]  }
  0xd4   :  { %7164 = vmatpush3.bf16.msra.mxu0 %v7984_v62  ;;  %v8032_v62 = vld [vmem:[#allocation5 + $0x620] sm:$0xff]  }
  0xd5   :  { %7186 = vmatpush3.bf16.msra.mxu1 %v7985_v63  ;;  %7193 = vmatprep.subr.bf16.mxu0 %v7986_v8  ;;  %v8033_v63 = vld [vmem:[#allocation5 + $0x6a0] sm:$0xff]   ;;  %v8042_v8 = vld [vmem:[#allocation5 + $0x648] sm:$0xff]  }
  0xd6   :  { %7215 = vmatprep.subr.bf16.mxu1 %v7987_v9  ;;  %v8043_v9 = vld [vmem:[#allocation5 + $0x6c8] sm:$0xff]  }
  0xd7   :  { %5183 = vmatmul.mubr.bf16.vlgmr.msra.gmra.mxu0 %v159_v6  ;;  %v8040_v6 = vld [vmem:[#allocation5 + $0x610] sm:$0xff]  }
  0xd8   :  { %5223 = vmatmul.mubr.bf16.vlgmr.msra.gmra.mxu1 %v161_v7  ;;  %7194 = vmatpush3.bf16.msra.mxu0 %v7988_v10  ;;  %v8041_v7 = vld [vmem:[#allocation5 + $0x690] sm:$0xff]   ;;  %v8044_v10 = vld [vmem:[#allocation5 + $0x608] sm:$0xff]  }
  0xd9   :  { %7216 = vmatpush3.bf16.msra.mxu1 %v7989_v11  ;;  %7195 = vmatprep.subr.bf16.mxu0 %v7990_v12  ;;  %v8045_v11 = vld [vmem:[#allocation5 + $0x688] sm:$0xff]   ;;  %v8046_v12 = vld [vmem:[#allocation5 + $0x640] sm:$0xff]  }
  0xda   :  { %7217 = vmatprep.subr.bf16.mxu1 %v7991_v13  ;;  %5262 = vmatprep.mubr.bf16.mxu0 %v164_v41  ;;  %v8055_v41 = vld [vmem:[#allocation5 + $0x7f0] sm:$0xff]  }
  0xdb   :  { %5302 = vmatprep.mubr.bf16.mxu1 %v166_v45  ;;  %v8058_v45 = vld [vmem:[#allocation5 + $0x768] sm:$0xff]  }
  0xdc   :  { %7196 = vmatpush3.bf16.msra.mxu0 %v7992_v14 }
  0xdd   :  { %7218 = vmatpush3.bf16.msra.mxu1 %v7993_v15  ;;  %7197 = vmatprep.subr.bf16.mxu0 %v7994_v16  ;;  %v8047_v15 = vld [vmem:[#allocation5 + $0x6c0] sm:$0xff]  }
  0xde   :  { %7219 = vmatprep.subr.bf16.mxu1 %v7995_v17  ;;  %v8048_v16 = vld [vmem:[#allocation5 + $0x600] sm:$0xff]  }
  0xe0   :  { %7198 = vmatpush3.bf16.msra.mxu0 %v7996_v18 }
  0xe1   :  { %7220 = vmatpush3.bf16.msra.mxu1 %v7997_v19  ;;  %7199 = vmatprep.subr.bf16.mxu0 %v7998_v20  ;;  %v8049_v19 = vld [vmem:[#allocation5 + $0x680] sm:$0xff]  }
  0xe2   :  { %7221 = vmatprep.subr.bf16.mxu1 %v7999_v21 }
  0xe4   :  { %7200 = vmatpush3.bf16.msra.mxu0 %v8000_v22  ;;  %v96_v22 = vld [vmem:[#allocation2 + $0xc8] sm:$0xff] }
  0xe5   :  { %7222 = vmatpush3.bf16.msra.mxu1 %v8001_v23  ;;  %7201 = vmatprep.subr.bf16.mxu0 %v8002_v24  ;;  %v98_v23 = vld [vmem:[#allocation2 + $0xd8] sm:$0xff]  ;;  %v95_v24 = vld [vmem:[#allocation2 + $0xc0] sm:$0xff] }
  0xe6   :  { %7223 = vmatprep.subr.bf16.mxu1 %v8003_v25 }
  0xe8   :  { %7202 = vmatpush3.bf16.msra.mxu0 %v8004_v26 }
  0xe9   :  { %7224 = vmatpush3.bf16.msra.mxu1 %v8005_v27  ;;  %7203 = vmatprep.subr.bf16.mxu0 %v8006_v28  ;;  %v168_v27 = vpack.c.bf16 %v96_v22, %v96_v22  ;;  %v170_v28 = vpack.c.bf16 %v98_v23, %v98_v23  ;;  %v8082_v22 = vld [vmem:[#allocation5 + $0x878] sm:$0xff]  }
  0xea   :  { %7225 = vmatprep.subr.bf16.mxu1 %v8007_v29  ;;  %v167_v29 = vpack.c.bf16 %v95_v24, %v95_v24  ;;  %v8083_v24 = vld [vmem:[#allocation5 + $0x8f8] sm:$0xff]  }
  0xec   :  { %7204 = vmatpush3.bf16.msra.mxu0 %v8008_v30  ;;  %v97_v30 = vld [vmem:[#allocation2 + $0xd0] sm:$0xff] }
  0xed   :  { %7226 = vmatpush3.bf16.msra.mxu1 %v8009_v31  ;;  %7205 = vmatprep.subr.bf16.mxu0 %v8010_v32  ;;  %v169_v31 = vpack.c.bf16 %v97_v30, %v97_v30  ;;  %v8050_v32 = vld [vmem:[#allocation5 + $0x778] sm:$0xff]   ;;  %v8087_v30 = vld [vmem:[#allocation5 + $0x8f0] sm:$0xff]  }
  0xee   :  { %7227 = vmatprep.subr.bf16.mxu1 %v8011_v33 }
  0xf0   :  { %7206 = vmatpush3.bf16.msra.mxu0 %v8012_v34 }
  0xf1   :  { %7228 = vmatpush3.bf16.msra.mxu1 %v8013_v35  ;;  %7207 = vmatprep.subr.bf16.mxu0 %v8014_v36  ;;  %v8051_v35 = vld [vmem:[#allocation5 + $0x7f8] sm:$0xff]  }
  0xf2   :  { %7229 = vmatprep.subr.bf16.mxu1 %v8015_v37  ;;  %v8052_v36 = vld [vmem:[#allocation5 + $0x738] sm:$0xff]  }
  0xf3   :  { %v8053_v37 = vld [vmem:[#allocation5 + $0x7b8] sm:$0xff]  }
  0xf4   :  { %7208 = vmatpush3.bf16.msra.mxu0 %v8016_v38  ;;  %v6395_v38 = vld [vmem:[#allocation7] ss:$0 sm:$0xff] }
  0xf5   :  { %7230 = vmatpush3.bf16.msra.mxu1 %v8017_v39  ;;  %7237 = vmatprep.subr.bf16.mxu0 %v8018_v48  ;;  %v8061_v48 = vld [vmem:[#allocation5 + $0x7a8] sm:$0xff]  }
  0xf6   :  { %7259 = vmatprep.subr.bf16.mxu1 %v8019_v49  ;;  %v8062_v49 = vld [vmem:[#allocation5 + $0x760] sm:$0xff]  }
  0xf7   :  { %5263 = vmatmul.mubr.bf16.vlgmr.msra.gmra.mxu0 %v163_v46  ;;  %v8059_v46 = vld [vmem:[#allocation5 + $0x7e8] sm:$0xff]  }
  0xf8   :  { %5303 = vmatmul.mubr.bf16.vlgmr.msra.gmra.mxu1 %v165_v47  ;;  %7238 = vmatpush3.bf16.msra.mxu0 %v8020_v50  ;;  %v8060_v47 = vld [vmem:[#allocation5 + $0x728] sm:$0xff]   ;;  %v8063_v50 = vld [vmem:[#allocation5 + $0x7e0] sm:$0xff]  }
  0xf9   :  { %7260 = vmatpush3.bf16.msra.mxu1 %v8021_v51  ;;  %7239 = vmatprep.subr.bf16.mxu0 %v8022_v52  ;;  %v8064_v51 = vld [vmem:[#allocation5 + $0x720] sm:$0xff]  }
  0xfa   :  { %7261 = vmatprep.subr.bf16.mxu1 %v8023_v53  ;;  %5342 = vmatprep.mubr.bf16.mxu0 %v168_v27  ;;  %v8065_v52 = vld [vmem:[#allocation5 + $0x7a0] sm:$0xff]   ;;  %v8066_v53 = vld [vmem:[#allocation5 + $0x758] sm:$0xff]  }
  0xfb   :  { %5382 = vmatprep.mubr.bf16.mxu1 %v170_v28  ;;  %v8084_v27 = vld [vmem:[#allocation5 + $0x838] sm:$0xff]  }
  0xfc   :  { %7240 = vmatpush3.bf16.msra.mxu0 %v8024_v54  ;;  %v8067_v54 = vld [vmem:[#allocation5 + $0x7d8] sm:$0xff]  }
  0xfd   :  { %7262 = vmatpush3.bf16.msra.mxu1 %v8025_v55  ;;  %7241 = vmatprep.subr.bf16.mxu0 %v8026_v56  ;;  %v8068_v55 = vld [vmem:[#allocation5 + $0x718] sm:$0xff]  }
  0xfe   :  { %7263 = vmatprep.subr.bf16.mxu1 %v8027_v57  ;;  %v8069_v56 = vld [vmem:[#allocation5 + $0x798] sm:$0xff]   ;;  %v8070_v57 = vld [vmem:[#allocation5 + $0x750] sm:$0xff]  }
  0xff   :  { %v8085_v28 = vld [vmem:[#allocation5 + $0x8b8] sm:$0xff]  }
 0x100   :  { %7242 = vmatpush3.bf16.msra.mxu0 %v8028_v58  ;;  %v8071_v58 = vld [vmem:[#allocation5 + $0x7d0] sm:$0xff]  }
 0x101   :  { %7264 = vmatpush3.bf16.msra.mxu1 %v8029_v59  ;;  %7243 = vmatprep.subr.bf16.mxu0 %v8030_v60  ;;  %v8072_v59 = vld [vmem:[#allocation5 + $0x710] sm:$0xff]  }
 0x102   :  { %7265 = vmatprep.subr.bf16.mxu1 %v8031_v61  ;;  %v8073_v60 = vld [vmem:[#allocation5 + $0x790] sm:$0xff]   ;;  %v8074_v61 = vld [vmem:[#allocation5 + $0x748] sm:$0xff]  }
 0x104   :  { %7244 = vmatpush3.bf16.msra.mxu0 %v8032_v62  ;;  %v8075_v62 = vld [vmem:[#allocation5 + $0x7c8] sm:$0xff]  }
 0x105   :  { %7266 = vmatpush3.bf16.msra.mxu1 %v8033_v63  ;;  %7245 = vmatprep.subr.bf16.mxu0 %v8034_v0  ;;  %v8076_v63 = vld [vmem:[#allocation5 + $0x708] sm:$0xff]  }
 0x106   :  { %7267 = vmatprep.subr.bf16.mxu1 %v8035_v1  ;;  %v8077_v0 = vld [vmem:[#allocation5 + $0x788] sm:$0xff]  }
 0x108   :  { %7246 = vmatpush3.bf16.msra.mxu0 %v8036_v2  ;;  %v8078_v2 = vld [vmem:[#allocation5 + $0x740] sm:$0xff]  }
 0x109   :  { %7268 = vmatpush3.bf16.msra.mxu1 %v8037_v3  ;;  %7247 = vmatprep.subr.bf16.mxu0 %v8038_v4  ;;  %v8079_v4 = vld [vmem:[#allocation5 + $0x7c0] sm:$0xff]  }
 0x10a   :  { %7269 = vmatprep.subr.bf16.mxu1 %v8039_v5 }
 0x10c   :  { %7248 = vmatpush3.bf16.msra.mxu0 %v8040_v6  ;;  %v8080_v6 = vld [vmem:[#allocation5 + $0x700] sm:$0xff]  }
 0x10d   :  { %7270 = vmatpush3.bf16.msra.mxu1 %v8041_v7  ;;  %7249 = vmatprep.subr.bf16.mxu0 %v8042_v8 }
 0x10e   :  { %7271 = vmatprep.subr.bf16.mxu1 %v8043_v9  ;;  %v8081_v9 = vld [vmem:[#allocation5 + $0x780] sm:$0xff]  }
 0x110   :  { %7250 = vmatpush3.bf16.msra.mxu0 %v8044_v10  ;;  %v100_v10 = vld [vmem:[#allocation2 + $0xe8] sm:$0xff] }
 0x111   :  { %7272 = vmatpush3.bf16.msra.mxu1 %v8045_v11  ;;  %7251 = vmatprep.subr.bf16.mxu0 %v8046_v12 }
 0x112   :  { %7273 = vmatprep.subr.bf16.mxu1 %v8047_v15  ;;  %v99_v15 = vld [vmem:[#allocation2 + $0xe0] sm:$0xff] }
 0x114   :  { %7252 = vmatpush3.bf16.msra.mxu0 %v8048_v16  ;;  %v101_v16 = vld [vmem:[#allocation2 + $0xf0] sm:$0xff] }
 0x115   :  { %7274 = vmatpush3.bf16.msra.mxu1 %v8049_v19  ;;  %7281 = vmatprep.subr.bf16.mxu0 %v8050_v32  ;;  %v8089_v32 = vld [vmem:[#allocation5 + $0x8b0] sm:$0xff]  }
 0x116   :  { %7303 = vmatprep.subr.bf16.mxu1 %v8051_v35  ;;  %v8092_v35 = vld [vmem:[#allocation5 + $0x828] sm:$0xff]  }
 0x117   :  { %v6989_v13 = vpop.f32.mrf.mxu0  ;;  %5343 = vmatmul.mubr.bf16.vlgmr.msra.gmra.mxu0 %v167_v29  ;;  %v8086_v29 = vld [vmem:[#allocation5 + $0x870] sm:$0xff]  }
 0x118   :  { %v7011_v14 = vpop.f32.mrf.mxu1  ;;  %5383 = vmatmul.mubr.bf16.vlgmr.msra.gmra.mxu1 %v169_v31  ;;  %7282 = vmatpush3.bf16.msra.mxu0 %v8052_v36  ;;  %v8088_v31 = vld [vmem:[#allocation5 + $0x830] sm:$0xff]   ;;  %v8093_v36 = vld [vmem:[#allocation5 + $0x8a8] sm:$0xff]  }
 0x119   :  { %v6990_v17 = vpop.f32.mrf.mxu0  ;;  %7304 = vmatpush3.bf16.msra.mxu1 %v8053_v37  ;;  %7283 = vmatprep.subr.bf16.mxu0 %v8054_v40  ;;  %v8094_v37 = vld [vmem:[#allocation5 + $0x860] sm:$0xff]  }
 0x11a   :  { %v7012_v18 = vpop.f32.mrf.mxu1  ;;  %v6991_v20 = vadd.f32 %v6990_v17, %v6989_v13  ;;  %7305 = vmatprep.subr.bf16.mxu1 %v8055_v41  ;;  %v172_v13 = vpack.c.bf16 %v100_v10, %v100_v10  ;;  %v8097_v40 = vld [vmem:[#allocation5 + $0x8a0] sm:$0xff]   ;;  %v8098_v41 = vld [vmem:[#allocation5 + $0x858] sm:$0xff]  }
 0x11b   :  { %v7013_v21 = vadd.f32 %v7012_v18, %v7011_v14  ;;  %v6992_v25 = vpop.f32.mrf.mxu0  ;;  %v102_v14 = vld [vmem:[#allocation2 + $0xf8] sm:$0xff] }
 0x11c   :  { %v7014_v26 = vpop.f32.mrf.mxu1  ;;  %v4865_v39 = vadd.f32 %v6991_v20, %v6395_v38  ;;  %7284 = vmatpush3.bf16.msra.mxu0 %v8056_v43  ;;  %v174_v19 = vpack.c.bf16 %v102_v14, %v102_v14  ;;  %v171_v20 = vpack.c.bf16 %v99_v15, %v99_v15  ;;  %5422 = vmatprep.mubr.bf16.mxu0 %v172_v13  ;;  %v8095_v38 = vld [vmem:[#allocation5 + $0x8e0] sm:$0xff]   ;;  %v8100_v43 = vld [vmem:[#allocation5 + $0x818] sm:$0xff]  }
 0x11d   :  { %v6993_v33 = vpop.f32.mrf.mxu0  ;;  %7306 = vmatpush3.bf16.msra.mxu1 %v8057_v44  ;;  %7285 = vmatprep.subr.bf16.mxu0 %v8058_v45  ;;  %v8101_v44 = vld [vmem:[#allocation5 + $0x898] sm:$0xff]   ;;  %v8102_v45 = vld [vmem:[#allocation5 + $0x850] sm:$0xff]  }
 0x11e   :  { %v7015_v34 = vpop.f32.mrf.mxu1  ;;  %v8565_v42 = vadd.f32 %v7013_v21, %v4865_v39  ;;  %7307 = vmatprep.subr.bf16.mxu1 %v8059_v46  ;;  %v173_v21 = vpack.c.bf16 %v101_v16, %v101_v16  ;;  %5462 = vmatprep.mubr.bf16.mxu1 %v174_v19  ;;  %v8090_v33 = vld [vmem:[#allocation5 + $0x868] sm:$0xff]   ;;  %v8096_v39 = vld [vmem:[#allocation5 + $0x820] sm:$0xff]   ;;  %v8103_v46 = vld [vmem:[#allocation5 + $0x8d0] sm:$0xff]  }
 0x11f   :  { %v8091_v34 = vld [vmem:[#allocation5 + $0x8e8] sm:$0xff]   ;;  %v8115_v14 = vld [vmem:[#allocation5 + $0x9f8] sm:$0xff]   ;;  %v8120_v19 = vld [vmem:[#allocation5 + $0x930] sm:$0xff]  }
 0x120   :  { %7286 = vmatpush3.bf16.msra.mxu0 %v8060_v47  ;;  %v8104_v47 = vld [vmem:[#allocation5 + $0x810] sm:$0xff]   ;;  %v8116_v15 = vld [vmem:[#allocation5 + $0x938] sm:$0xff]  }
 0x121   :  { %7308 = vmatpush3.bf16.msra.mxu1 %v8061_v48  ;;  %7287 = vmatprep.subr.bf16.mxu0 %v8062_v49  ;;  %v8105_v48 = vld [vmem:[#allocation5 + $0x890] sm:$0xff]   ;;  %v8106_v49 = vld [vmem:[#allocation5 + $0x848] sm:$0xff]   ;;  %v8117_v16 = vld [vmem:[#allocation5 + $0x9b8] sm:$0xff]  }
 0x122   :  { %7309 = vmatprep.subr.bf16.mxu1 %v8063_v50  ;;  %v8107_v50 = vld [vmem:[#allocation5 + $0x8c8] sm:$0xff]  }
 0x124   :  { %7288 = vmatpush3.bf16.msra.mxu0 %v8064_v51  ;;  %v8108_v51 = vld [vmem:[#allocation5 + $0x808] sm:$0xff]  }
 0x125   :  { %7310 = vmatpush3.bf16.msra.mxu1 %v8065_v52  ;;  %7289 = vmatprep.subr.bf16.mxu0 %v8066_v53  ;;  %v8109_v52 = vld [vmem:[#allocation5 + $0x888] sm:$0xff]  }
 0x126   :  { %7311 = vmatprep.subr.bf16.mxu1 %v8067_v54  ;;  %v8110_v54 = vld [vmem:[#allocation5 + $0x840] sm:$0xff]  }
 0x128   :  { %7290 = vmatpush3.bf16.msra.mxu0 %v8068_v55 }
 0x129   :  { %7312 = vmatpush3.bf16.msra.mxu1 %v8069_v56  ;;  %7291 = vmatprep.subr.bf16.mxu0 %v8070_v57  ;;  %v8111_v56 = vld [vmem:[#allocation5 + $0x8c0] sm:$0xff]  }
 0x12a   :  { %7313 = vmatprep.subr.bf16.mxu1 %v8071_v58  ;;  %v8112_v58 = vld [vmem:[#allocation5 + $0x800] sm:$0xff]  }
 0x12c   :  { %7292 = vmatpush3.bf16.msra.mxu0 %v8072_v59 }
 0x12d   :  { %7314 = vmatpush3.bf16.msra.mxu1 %v8073_v60  ;;  %7293 = vmatprep.subr.bf16.mxu0 %v8074_v61  ;;  %v8113_v61 = vld [vmem:[#allocation5 + $0x880] sm:$0xff]  }
 0x12e   :  { %7315 = vmatprep.subr.bf16.mxu1 %v8075_v62 }
 0x130   :  { %7294 = vmatpush3.bf16.msra.mxu0 %v8076_v63 }
 0x131   :  { %7316 = vmatpush3.bf16.msra.mxu1 %v8077_v0  ;;  %7295 = vmatprep.subr.bf16.mxu0 %v8078_v2  ;;  %v104_v0 = vld [vmem:[#allocation2 + $0x108] sm:$0xff]  ;;  %v103_v2 = vld [vmem:[#allocation2 + $0x100] sm:$0xff] }
 0x132   :  { %7317 = vmatprep.subr.bf16.mxu1 %v8079_v4 }
 0x134   :  { %7296 = vmatpush3.bf16.msra.mxu0 %v8080_v6 }
 0x135   :  { %7318 = vmatpush3.bf16.msra.mxu1 %v8081_v9  ;;  %7325 = vmatprep.subr.bf16.mxu0 %v8082_v22  ;;  %v8123_v22 = vld [vmem:[#allocation5 + $0x9e8] sm:$0xff]  }
 0x136   :  { %7347 = vmatprep.subr.bf16.mxu1 %v8083_v24  ;;  %v8125_v24 = vld [vmem:[#allocation5 + $0x9a8] sm:$0xff]  }
 0x137   :  { %v7033_v1 = vpop.f32.mrf.mxu0  ;;  %5423 = vmatmul.mubr.bf16.vlgmr.msra.gmra.mxu0 %v171_v20  ;;  %v8121_v20 = vld [vmem:[#allocation5 + $0x9b0] sm:$0xff]  }
 0x138   :  { %v7055_v3 = vpop.f32.mrf.mxu1  ;;  %5463 = vmatmul.mubr.bf16.vlgmr.msra.gmra.mxu1 %v173_v21  ;;  %7326 = vmatpush3.bf16.msra.mxu0 %v8084_v27  ;;  %v8122_v21 = vld [vmem:[#allocation5 + $0x968] sm:$0xff]   ;;  %v8128_v27 = vld [vmem:[#allocation5 + $0x920] sm:$0xff]  }
 0x139   :  { %v7034_v5 = vpop.f32.mrf.mxu0  ;;  %7348 = vmatpush3.bf16.msra.mxu1 %v8085_v28  ;;  %7327 = vmatprep.subr.bf16.mxu0 %v8086_v29  ;;  %v8129_v28 = vld [vmem:[#allocation5 + $0x9a0] sm:$0xff]   ;;  %v8130_v29 = vld [vmem:[#allocation5 + $0x958] sm:$0xff]  }
 0x13a   :  { %v7035_v7 = vadd.f32 %v7034_v5, %v7033_v1  ;;  %v7056_v8 = vpop.f32.mrf.mxu1  ;;  %7349 = vmatprep.subr.bf16.mxu1 %v8087_v30  ;;  %v106_v1 = vld [vmem:[#allocation2 + $0x118] sm:$0xff]  ;;  %v176_v5 = vpack.c.bf16 %v104_v0, %v104_v0 }
 0x13b   :  { %v7057_v11 = vadd.f32 %v7056_v8, %v7055_v3  ;;  %v7036_v12 = vpop.f32.mrf.mxu0  ;;  %v178_v6 = vpack.c.bf16 %v106_v1, %v106_v1  ;;  %v105_v8 = vld [vmem:[#allocation2 + $0x110] sm:$0xff]  ;;  %v8131_v30 = vld [vmem:[#allocation5 + $0x9d8] sm:$0xff]  }
 0x13c   :  { %v4945_v17 = vadd.f32 %v7035_v7, %v8565_v42  ;;  %v7058_v18 = vpop.f32.mrf.mxu1  ;;  %7328 = vmatpush3.bf16.msra.mxu0 %v8088_v31  ;;  %v8099_v42 = vld [vmem:[#allocation5 + $0x8d8] sm:$0xff]   ;;  %v175_v7 = vpack.c.bf16 %v103_v2, %v103_v2  ;;  %v177_v10 = vpack.c.bf16 %v105_v8, %v105_v8  ;;  %5502 = vmatprep.mubr.bf16.mxu0 %v176_v5  ;;  %v8150_v5 = vld [vmem:[#allocation5 + $0xa70] sm:$0xff]  }
 0x13d   :  { %v7037_v23 = vpop.f32.mrf.mxu0  ;;  %7350 = vmatpush3.bf16.msra.mxu1 %v8089_v32  ;;  %7329 = vmatprep.subr.bf16.mxu0 %v8090_v33  ;;  %v8119_v18 = vld [vmem:[#allocation5 + $0x9f0] sm:$0xff]   ;;  %v8132_v31 = vld [vmem:[#allocation5 + $0x918] sm:$0xff]  }
 0x13e   :  { %v8568_v25 = vadd.f32 %v7057_v11, %v4945_v17  ;;  %v7059_v26 = vpop.f32.mrf.mxu1  ;;  %7351 = vmatprep.subr.bf16.mxu1 %v8091_v34  ;;  %v8114_v11 = vld [vmem:[#allocation5 + $0x978] sm:$0xff]   ;;  %5542 = vmatprep.mubr.bf16.mxu1 %v178_v6  ;;  %v8118_v17 = vld [vmem:[#allocation5 + $0x970] sm:$0xff]   ;;  %v8124_v23 = vld [vmem:[#allocation5 + $0x928] sm:$0xff]  }
 0x13f   :  { %v8127_v26 = vld [vmem:[#allocation5 + $0x9e0] sm:$0xff]   ;;  %v8133_v32 = vld [vmem:[#allocation5 + $0x998] sm:$0xff]   ;;  %v8134_v33 = vld [vmem:[#allocation5 + $0x950] sm:$0xff]  }
 0x140   :  { %7330 = vmatpush3.bf16.msra.mxu0 %v8092_v35  ;;  %v8135_v34 = vld [vmem:[#allocation5 + $0x9d0] sm:$0xff]   ;;  %v8147_v1 = vld [vmem:[#allocation5 + $0xaf8] sm:$0xff]  }
 0x141   :  { %7352 = vmatpush3.bf16.msra.mxu1 %v8093_v36  ;;  %7331 = vmatprep.subr.bf16.mxu0 %v8094_v37  ;;  %v8136_v35 = vld [vmem:[#allocation5 + $0x910] sm:$0xff]   ;;  %v8138_v37 = vld [vmem:[#allocation5 + $0x948] sm:$0xff]  }
 0x142   :  { %7353 = vmatprep.subr.bf16.mxu1 %v8095_v38  ;;  %v8137_v36 = vld [vmem:[#allocation5 + $0x990] sm:$0xff]   ;;  %v8139_v38 = vld [vmem:[#allocation5 + $0x9c8] sm:$0xff]  }
 0x143   :  { %v8151_v6 = vld [vmem:[#allocation5 + $0xaf0] sm:$0xff]  }
 0x144   :  { %7332 = vmatpush3.bf16.msra.mxu0 %v8096_v39  ;;  %v8140_v39 = vld [vmem:[#allocation5 + $0x908] sm:$0xff]   ;;  %v8153_v8 = vld [vmem:[#allocation5 + $0xab0] sm:$0xff]  }
 0x145   :  { %7354 = vmatpush3.bf16.msra.mxu1 %v8097_v40  ;;  %7333 = vmatprep.subr.bf16.mxu0 %v8098_v41  ;;  %v8141_v40 = vld [vmem:[#allocation5 + $0x988] sm:$0xff]  }
 0x146   :  { %7355 = vmatprep.subr.bf16.mxu1 %v8099_v42 }
 0x148   :  { %7334 = vmatpush3.bf16.msra.mxu0 %v8100_v43  ;;  %v8142_v43 = vld [vmem:[#allocation5 + $0x940] sm:$0xff]  }
 0x149   :  { %7356 = vmatpush3.bf16.msra.mxu1 %v8101_v44  ;;  %7335 = vmatprep.subr.bf16.mxu0 %v8102_v45  ;;  %v8143_v44 = vld [vmem:[#allocation5 + $0x9c0] sm:$0xff]  }
 0x14a   :  { %7357 = vmatprep.subr.bf16.mxu1 %v8103_v46 }
 0x14c   :  { %7336 = vmatpush3.bf16.msra.mxu0 %v8104_v47  ;;  %v8144_v47 = vld [vmem:[#allocation5 + $0x900] sm:$0xff]  }
 0x14d   :  { %7358 = vmatpush3.bf16.msra.mxu1 %v8105_v48  ;;  %7337 = vmatprep.subr.bf16.mxu0 %v8106_v49 }
 0x14e   :  { %7359 = vmatprep.subr.bf16.mxu1 %v8107_v50  ;;  %v8145_v50 = vld [vmem:[#allocation5 + $0x980] sm:$0xff]  }
 0x150   :  { %7338 = vmatpush3.bf16.msra.mxu0 %v8108_v51  ;;  %v108_v51 = vld [vmem:[#allocation2 + $0x128] sm:$0xff] }
 0x151   :  { %7360 = vmatpush3.bf16.msra.mxu1 %v8109_v52  ;;  %7339 = vmatprep.subr.bf16.mxu0 %v8110_v54  ;;  %v110_v52 = vld [vmem:[#allocation2 + $0x138] sm:$0xff] }
 0x152   :  { %7361 = vmatprep.subr.bf16.mxu1 %v8111_v56  ;;  %v182_v56 = vpack.c.bf16 %v110_v52, %v110_v52  ;;  %v8179_v52 = vld [vmem:[#allocation5 + $0xbf8] sm:$0xff]  }
 0x154   :  { %7340 = vmatpush3.bf16.msra.mxu0 %v8112_v58  ;;  %v109_v58 = vld [vmem:[#allocation2 + $0x130] sm:$0xff] }
 0x155   :  { %7362 = vmatpush3.bf16.msra.mxu1 %v8113_v61  ;;  %7369 = vmatprep.subr.bf16.mxu0 %v8114_v11  ;;  %v181_v61 = vpack.c.bf16 %v109_v58, %v109_v58  ;;  %v8156_v11 = vld [vmem:[#allocation5 + $0xa28] sm:$0xff]   ;;  %v8183_v58 = vld [vmem:[#allocation5 + $0xbf0] sm:$0xff]  }
 0x156   :  { %7391 = vmatprep.subr.bf16.mxu1 %v8115_v14  ;;  %v8159_v14 = vld [vmem:[#allocation5 + $0xae0] sm:$0xff]  }
 0x157   :  { %v7077_v53 = vpop.f32.mrf.mxu0  ;;  %5503 = vmatmul.mubr.bf16.vlgmr.msra.gmra.mxu0 %v175_v7  ;;  %v8152_v7 = vld [vmem:[#allocation5 + $0xa30] sm:$0xff]  }
 0x158   :  { %v7099_v55 = vpop.f32.mrf.mxu1  ;;  %5543 = vmatmul.mubr.bf16.vlgmr.msra.gmra.mxu1 %v177_v10  ;;  %7370 = vmatpush3.bf16.msra.mxu0 %v8116_v15  ;;  %v8155_v10 = vld [vmem:[#allocation5 + $0xae8] sm:$0xff]   ;;  %v8160_v15 = vld [vmem:[#allocation5 + $0xa20] sm:$0xff]  }
 0x159   :  { %v7078_v57 = vpop.f32.mrf.mxu0  ;;  %7392 = vmatpush3.bf16.msra.mxu1 %v8117_v16  ;;  %7371 = vmatprep.subr.bf16.mxu0 %v8118_v17  ;;  %v8161_v16 = vld [vmem:[#allocation5 + $0xaa0] sm:$0xff]   ;;  %v8162_v17 = vld [vmem:[#allocation5 + $0xa58] sm:$0xff]  }
 0x15a   :  { %v7079_v59 = vadd.f32 %v7078_v57, %v7077_v53  ;;  %v7100_v60 = vpop.f32.mrf.mxu1  ;;  %7393 = vmatprep.subr.bf16.mxu1 %v8119_v18  ;;  %v107_v57 = vld [vmem:[#allocation2 + $0x120] sm:$0xff]  ;;  %5622 = vmatprep.mubr.bf16.mxu1 %v182_v56  ;;  %v8163_v18 = vld [vmem:[#allocation5 + $0xad8] sm:$0xff]  }
 0x15b   :  { %v7101_v62 = vadd.f32 %v7100_v60, %v7099_v55  ;;  %v7080_v63 = vpop.f32.mrf.mxu0  ;;  %v180_v55 = vpack.c.bf16 %v108_v51, %v108_v51  ;;  %v179_v60 = vpack.c.bf16 %v107_v57, %v107_v57  ;;  %v8181_v56 = vld [vmem:[#allocation5 + $0xbb8] sm:$0xff]   ;;  %v8182_v57 = vld [vmem:[#allocation5 + $0xb70] sm:$0xff]  }
 0x15c   :  { %v5025_v3 = vadd.f32 %v7079_v59, %v8568_v25  ;;  %v7102_v4 = vpop.f32.mrf.mxu1  ;;  %7372 = vmatpush3.bf16.msra.mxu0 %v8120_v19  ;;  %v8126_v25 = vld [vmem:[#allocation5 + $0x960] sm:$0xff]   ;;  %v8164_v19 = vld [vmem:[#allocation5 + $0xa18] sm:$0xff]  }
 0x15d   :  { %v7081_v9 = vpop.f32.mrf.mxu0  ;;  %7394 = vmatpush3.bf16.msra.mxu1 %v8121_v20  ;;  %7373 = vmatprep.subr.bf16.mxu0 %v8122_v21  ;;  %v8149_v4 = vld [vmem:[#allocation5 + $0xab8] sm:$0xff]   ;;  %v8166_v21 = vld [vmem:[#allocation5 + $0xa50] sm:$0xff]  }
 0x15e   :  { %v8571_v12 = vadd.f32 %v7101_v62, %v5025_v3  ;;  %v7103_v13 = vpop.f32.mrf.mxu1  ;;  %7395 = vmatprep.subr.bf16.mxu1 %v8123_v22  ;;  %v8146_v62 = vld [vmem:[#allocation5 + $0xa78] sm:$0xff]   ;;  %5582 = vmatprep.mubr.bf16.mxu0 %v180_v55  ;;  %v8154_v9 = vld [vmem:[#allocation5 + $0xa68] sm:$0xff]   ;;  %v8167_v22 = vld [vmem:[#allocation5 + $0xad0] sm:$0xff]  }
 0x15f   :  { %v8148_v3 = vld [vmem:[#allocation5 + $0xa38] sm:$0xff]   ;;  %v8158_v13 = vld [vmem:[#allocation5 + $0xa60] sm:$0xff]  }
 0x160   :  { %7374 = vmatpush3.bf16.msra.mxu0 %v8124_v23  ;;  %v8165_v20 = vld [vmem:[#allocation5 + $0xa98] sm:$0xff]   ;;  %v8168_v23 = vld [vmem:[#allocation5 + $0xa10] sm:$0xff]  }
 0x161   :  { %7396 = vmatpush3.bf16.msra.mxu1 %v8125_v24  ;;  %7375 = vmatprep.subr.bf16.mxu0 %v8126_v25  ;;  %v8169_v24 = vld [vmem:[#allocation5 + $0xa90] sm:$0xff]   ;;  %v8170_v25 = vld [vmem:[#allocation5 + $0xa48] sm:$0xff]   ;;  %v8180_v55 = vld [vmem:[#allocation5 + $0xb38] sm:$0xff]  }
 0x162   :  { %7397 = vmatprep.subr.bf16.mxu1 %v8127_v26  ;;  %v8171_v26 = vld [vmem:[#allocation5 + $0xac8] sm:$0xff]  }
 0x164   :  { %7376 = vmatpush3.bf16.msra.mxu0 %v8128_v27  ;;  %v8172_v27 = vld [vmem:[#allocation5 + $0xa08] sm:$0xff]  }
 0x165   :  { %7398 = vmatpush3.bf16.msra.mxu1 %v8129_v28  ;;  %7377 = vmatprep.subr.bf16.mxu0 %v8130_v29  ;;  %v8173_v28 = vld [vmem:[#allocation5 + $0xa88] sm:$0xff]  }
 0x166   :  { %7399 = vmatprep.subr.bf16.mxu1 %v8131_v30  ;;  %v8174_v30 = vld [vmem:[#allocation5 + $0xa40] sm:$0xff]  }
 0x168   :  { %7378 = vmatpush3.bf16.msra.mxu0 %v8132_v31 }
 0x169   :  { %7400 = vmatpush3.bf16.msra.mxu1 %v8133_v32  ;;  %7379 = vmatprep.subr.bf16.mxu0 %v8134_v33  ;;  %v8175_v32 = vld [vmem:[#allocation5 + $0xac0] sm:$0xff]  }
 0x16a   :  { %7401 = vmatprep.subr.bf16.mxu1 %v8135_v34  ;;  %v8176_v34 = vld [vmem:[#allocation5 + $0xa00] sm:$0xff]  }
 0x16c   :  { %7380 = vmatpush3.bf16.msra.mxu0 %v8136_v35 }
 0x16d   :  { %7402 = vmatpush3.bf16.msra.mxu1 %v8137_v36  ;;  %7381 = vmatprep.subr.bf16.mxu0 %v8138_v37  ;;  %v8177_v37 = vld [vmem:[#allocation5 + $0xa80] sm:$0xff]  }
 0x16e   :  { %7403 = vmatprep.subr.bf16.mxu1 %v8139_v38  ;;  %v112_v38 = vld [vmem:[#allocation2 + $0x148] sm:$0xff] }
 0x170   :  { %7382 = vmatpush3.bf16.msra.mxu0 %v8140_v39 }
 0x171   :  { %7404 = vmatpush3.bf16.msra.mxu1 %v8141_v40  ;;  %7383 = vmatprep.subr.bf16.mxu0 %v8142_v43  ;;  %v111_v43 = vld [vmem:[#allocation2 + $0x140] sm:$0xff] }
 0x172   :  { %7405 = vmatprep.subr.bf16.mxu1 %v8143_v44  ;;  %v113_v44 = vld [vmem:[#allocation2 + $0x150] sm:$0xff] }
 0x174   :  { %7384 = vmatpush3.bf16.msra.mxu0 %v8144_v47 }
 0x175   :  { %7406 = vmatpush3.bf16.msra.mxu1 %v8145_v50  ;;  %7413 = vmatprep.subr.bf16.mxu0 %v8146_v62  ;;  %v8178_v50 = vld [vmem:[#allocation5 + $0xb78] sm:$0xff]   ;;  %v8187_v62 = vld [vmem:[#allocation5 + $0xbe8] sm:$0xff]  }
 0x176   :  { %7435 = vmatprep.subr.bf16.mxu1 %v8147_v1  ;;  %v8190_v1 = vld [vmem:[#allocation5 + $0xb60] sm:$0xff]  }
 0x177   :  { %v7121_v41 = vpop.f32.mrf.mxu0  ;;  %5583 = vmatmul.mubr.bf16.vlgmr.msra.gmra.mxu0 %v179_v60  ;;  %v8185_v60 = vld [vmem:[#allocation5 + $0xbb0] sm:$0xff]  }
 0x178   :  { %v7143_v42 = vpop.f32.mrf.mxu1  ;;  %5623 = vmatmul.mubr.bf16.vlgmr.msra.gmra.mxu1 %v181_v61  ;;  %7414 = vmatpush3.bf16.msra.mxu0 %v8148_v3  ;;  %v8186_v61 = vld [vmem:[#allocation5 + $0xb68] sm:$0xff]   ;;  %v8192_v3 = vld [vmem:[#allocation5 + $0xb20] sm:$0xff]  }
 0x179   :  { %v7122_v45 = vpop.f32.mrf.mxu0  ;;  %7436 = vmatpush3.bf16.msra.mxu1 %v8149_v4  ;;  %7415 = vmatprep.subr.bf16.mxu0 %v8150_v5  ;;  %v8193_v4 = vld [vmem:[#allocation5 + $0xba0] sm:$0xff]   ;;  %v8194_v5 = vld [vmem:[#allocation5 + $0xb58] sm:$0xff]  }
 0x17a   :  { %v7144_v46 = vpop.f32.mrf.mxu1  ;;  %v7123_v48 = vadd.f32 %v7122_v45, %v7121_v41  ;;  %7437 = vmatprep.subr.bf16.mxu1 %v8151_v6  ;;  %v184_v41 = vpack.c.bf16 %v112_v38, %v112_v38  ;;  %v8195_v6 = vld [vmem:[#allocation5 + $0xbd8] sm:$0xff]  }
 0x17b   :  { %v7145_v49 = vadd.f32 %v7144_v46, %v7143_v42  ;;  %v7124_v53 = vpop.f32.mrf.mxu0  ;;  %v114_v42 = vld [vmem:[#allocation2 + $0x158] sm:$0xff] }
 0x17c   :  { %v7146_v54 = vpop.f32.mrf.mxu1  ;;  %v5105_v59 = vadd.f32 %v7123_v48, %v8571_v12  ;;  %7416 = vmatpush3.bf16.msra.mxu0 %v8152_v7  ;;  %v8157_v12 = vld [vmem:[#allocation5 + $0xaa8] sm:$0xff]   ;;  %v186_v47 = vpack.c.bf16 %v114_v42, %v114_v42  ;;  %v183_v48 = vpack.c.bf16 %v111_v43, %v111_v43  ;;  %5662 = vmatprep.mubr.bf16.mxu0 %v184_v41  ;;  %v8196_v7 = vld [vmem:[#allocation5 + $0xb18] sm:$0xff]  }
 0x17d   :  { %v7125_v63 = vpop.f32.mrf.mxu0  ;;  %7438 = vmatpush3.bf16.msra.mxu1 %v8153_v8  ;;  %7417 = vmatprep.subr.bf16.mxu0 %v8154_v9  ;;  %v8197_v8 = vld [vmem:[#allocation5 + $0xb98] sm:$0xff]   ;;  %v8198_v9 = vld [vmem:[#allocation5 + $0xb50] sm:$0xff]  }
 0x17e   :  { %v7147_v0 = vpop.f32.mrf.mxu1  ;;  %v8574_v2 = vadd.f32 %v7145_v49, %v5105_v59  ;;  %7439 = vmatprep.subr.bf16.mxu1 %v8155_v10  ;;  %v185_v49 = vpack.c.bf16 %v113_v44, %v113_v44  ;;  %5702 = vmatprep.mubr.bf16.mxu1 %v186_v47  ;;  %v8184_v59 = vld [vmem:[#allocation5 + $0xb30] sm:$0xff]   ;;  %v8188_v63 = vld [vmem:[#allocation5 + $0xb28] sm:$0xff]   ;;  %v8211_v42 = vld [vmem:[#allocation5 + $0xcf8] sm:$0xff]  }
 0x17f   :  { %v8189_v0 = vld [vmem:[#allocation5 + $0xba8] sm:$0xff]   ;;  %v8199_v10 = vld [vmem:[#allocation5 + $0xbd0] sm:$0xff]   ;;  %v8212_v43 = vld [vmem:[#allocation5 + $0xc38] sm:$0xff]  }
 0x180   :  { %7418 = vmatpush3.bf16.msra.mxu0 %v8156_v11  ;;  %v8200_v11 = vld [vmem:[#allocation5 + $0xb10] sm:$0xff]   ;;  %v8213_v44 = vld [vmem:[#allocation5 + $0xcb8] sm:$0xff]  }
 0x181   :  { %7440 = vmatpush3.bf16.msra.mxu1 %v8157_v12  ;;  %7419 = vmatprep.subr.bf16.mxu0 %v8158_v13  ;;  %v8201_v12 = vld [vmem:[#allocation5 + $0xb90] sm:$0xff]   ;;  %v8202_v13 = vld [vmem:[#allocation5 + $0xb48] sm:$0xff]  }
 0x182   :  { %7441 = vmatprep.subr.bf16.mxu1 %v8159_v14  ;;  %v8203_v14 = vld [vmem:[#allocation5 + $0xbc8] sm:$0xff]   ;;  %v8216_v47 = vld [vmem:[#allocation5 + $0xc30] sm:$0xff]  }
 0x184   :  { %7420 = vmatpush3.bf16.msra.mxu0 %v8160_v15  ;;  %v8204_v15 = vld [vmem:[#allocation5 + $0xb08] sm:$0xff]  }
 0x185   :  { %7442 = vmatpush3.bf16.msra.mxu1 %v8161_v16  ;;  %7421 = vmatprep.subr.bf16.mxu0 %v8162_v17  ;;  %v8205_v16 = vld [vmem:[#allocation5 + $0xb88] sm:$0xff]  }
 0x186   :  { %7443 = vmatprep.subr.bf16.mxu1 %v8163_v18  ;;  %v8206_v18 = vld [vmem:[#allocation5 + $0xb40] sm:$0xff]  }
 0x188   :  { %7422 = vmatpush3.bf16.msra.mxu0 %v8164_v19 }
 0x189   :  { %7444 = vmatpush3.bf16.msra.mxu1 %v8165_v20  ;;  %7423 = vmatprep.subr.bf16.mxu0 %v8166_v21  ;;  %v8207_v20 = vld [vmem:[#allocation5 + $0xbc0] sm:$0xff]  }
 0x18a   :  { %7445 = vmatprep.subr.bf16.mxu1 %v8167_v22  ;;  %v8208_v22 = vld [vmem:[#allocation5 + $0xb00] sm:$0xff]  }
 0x18c   :  { %7424 = vmatpush3.bf16.msra.mxu0 %v8168_v23 }
 0x18d   :  { %7446 = vmatpush3.bf16.msra.mxu1 %v8169_v24  ;;  %7425 = vmatprep.subr.bf16.mxu0 %v8170_v25  ;;  %v8209_v25 = vld [vmem:[#allocation5 + $0xb80] sm:$0xff]  }
 0x18e   :  { %7447 = vmatprep.subr.bf16.mxu1 %v8171_v26 }
 0x190   :  { %7426 = vmatpush3.bf16.msra.mxu0 %v8172_v27 }
 0x191   :  { %7448 = vmatpush3.bf16.msra.mxu1 %v8173_v28  ;;  %7427 = vmatprep.subr.bf16.mxu0 %v8174_v30  ;;  %v116_v28 = vld [vmem:[#allocation2 + $0x168] sm:$0xff]  ;;  %v115_v30 = vld [vmem:[#allocation2 + $0x160] sm:$0xff] }
 0x192   :  { %7449 = vmatprep.subr.bf16.mxu1 %v8175_v32 }
 0x194   :  { %7428 = vmatpush3.bf16.msra.mxu0 %v8176_v34 }
 0x195   :  { %7450 = vmatpush3.bf16.msra.mxu1 %v8177_v37  ;;  %7457 = vmatprep.subr.bf16.mxu0 %v8178_v50  ;;  %v8219_v50 = vld [vmem:[#allocation5 + $0xce8] sm:$0xff]  }
 0x196   :  { %7479 = vmatprep.subr.bf16.mxu1 %v8179_v52  ;;  %v8221_v52 = vld [vmem:[#allocation5 + $0xca8] sm:$0xff]  }
 0x197   :  { %v7165_v29 = vpop.f32.mrf.mxu0  ;;  %5663 = vmatmul.mubr.bf16.vlgmr.msra.gmra.mxu0 %v183_v48  ;;  %v8217_v48 = vld [vmem:[#allocation5 + $0xcb0] sm:$0xff]  }
 0x198   :  { %v7187_v31 = vpop.f32.mrf.mxu1  ;;  %5703 = vmatmul.mubr.bf16.vlgmr.msra.gmra.mxu1 %v185_v49  ;;  %7458 = vmatpush3.bf16.msra.mxu0 %v8180_v55  ;;  %v8218_v49 = vld [vmem:[#allocation5 + $0xc68] sm:$0xff]   ;;  %v8224_v55 = vld [vmem:[#allocation5 + $0xc20] sm:$0xff]  }
 0x199   :  { %v7166_v33 = vpop.f32.mrf.mxu0  ;;  %7480 = vmatpush3.bf16.msra.mxu1 %v8181_v56  ;;  %7459 = vmatprep.subr.bf16.mxu0 %v8182_v57  ;;  %v8225_v56 = vld [vmem:[#allocation5 + $0xca0] sm:$0xff]   ;;  %v8226_v57 = vld [vmem:[#allocation5 + $0xc58] sm:$0xff]  }
 0x19a   :  { %v7167_v35 = vadd.f32 %v7166_v33, %v7165_v29  ;;  %v7188_v36 = vpop.f32.mrf.mxu1  ;;  %7481 = vmatprep.subr.bf16.mxu1 %v8183_v58  ;;  %v118_v29 = vld [vmem:[#allocation2 + $0x178] sm:$0xff]  ;;  %v188_v33 = vpack.c.bf16 %v116_v28, %v116_v28 }
 0x19b   :  { %v7189_v39 = vadd.f32 %v7188_v36, %v7187_v31  ;;  %v7168_v40 = vpop.f32.mrf.mxu0  ;;  %v190_v34 = vpack.c.bf16 %v118_v29, %v118_v29  ;;  %v117_v36 = vld [vmem:[#allocation2 + $0x170] sm:$0xff]  ;;  %v8227_v58 = vld [vmem:[#allocation5 + $0xcd8] sm:$0xff]  }
 0x19c   :  { %v5185_v45 = vadd.f32 %v7167_v35, %v8574_v2  ;;  %v7190_v46 = vpop.f32.mrf.mxu1  ;;  %7460 = vmatpush3.bf16.msra.mxu0 %v8184_v59  ;;  %v8191_v2 = vld [vmem:[#allocation5 + $0xbe0] sm:$0xff]   ;;  %v187_v35 = vpack.c.bf16 %v115_v30, %v115_v30  ;;  %v189_v38 = vpack.c.bf16 %v117_v36, %v117_v36  ;;  %5742 = vmatprep.mubr.bf16.mxu0 %v188_v33  ;;  %v8228_v59 = vld [vmem:[#allocation5 + $0xc18] sm:$0xff]   ;;  %v8246_v33 = vld [vmem:[#allocation5 + $0xd70] sm:$0xff]  }
 0x19d   :  { %v7169_v51 = vpop.f32.mrf.mxu0  ;;  %7482 = vmatpush3.bf16.msra.mxu1 %v8185_v60  ;;  %7461 = vmatprep.subr.bf16.mxu0 %v8186_v61  ;;  %v8215_v46 = vld [vmem:[#allocation5 + $0xcf0] sm:$0xff]   ;;  %v8229_v60 = vld [vmem:[#allocation5 + $0xc98] sm:$0xff]  }
 0x19e   :  { %v8577_v53 = vadd.f32 %v7189_v39, %v5185_v45  ;;  %v7191_v54 = vpop.f32.mrf.mxu1  ;;  %7483 = vmatprep.subr.bf16.mxu1 %v8187_v62  ;;  %v8210_v39 = vld [vmem:[#allocation5 + $0xc78] sm:$0xff]   ;;  %5782 = vmatprep.mubr.bf16.mxu1 %v190_v34  ;;  %v8214_v45 = vld [vmem:[#allocation5 + $0xc70] sm:$0xff]   ;;  %v8220_v51 = vld [vmem:[#allocation5 + $0xc28] sm:$0xff]  }
 0x19f   :  { %v8223_v54 = vld [vmem:[#allocation5 + $0xce0] sm:$0xff]   ;;  %v8230_v61 = vld [vmem:[#allocation5 + $0xc50] sm:$0xff]   ;;  %v8243_v29 = vld [vmem:[#allocation5 + $0xdf8] sm:$0xff]  }
 0x1a0   :  { %7462 = vmatpush3.bf16.msra.mxu0 %v8188_v63  ;;  %v8231_v62 = vld [vmem:[#allocation5 + $0xcd0] sm:$0xff]  }
 0x1a1   :  { %7484 = vmatpush3.bf16.msra.mxu1 %v8189_v0  ;;  %7463 = vmatprep.subr.bf16.mxu0 %v8190_v1  ;;  %v8232_v63 = vld [vmem:[#allocation5 + $0xc10] sm:$0xff]   ;;  %v8234_v1 = vld [vmem:[#allocation5 + $0xc48] sm:$0xff]  }
 0x1a2   :  { %7485 = vmatprep.subr.bf16.mxu1 %v8191_v2  ;;  %v8233_v0 = vld [vmem:[#allocation5 + $0xc90] sm:$0xff]   ;;  %v8235_v2 = vld [vmem:[#allocation5 + $0xcc8] sm:$0xff]  }
 0x1a3   :  { %v8247_v34 = vld [vmem:[#allocation5 + $0xdf0] sm:$0xff]  }
 0x1a4   :  { %7464 = vmatpush3.bf16.msra.mxu0 %v8192_v3  ;;  %v8236_v3 = vld [vmem:[#allocation5 + $0xc08] sm:$0xff]   ;;  %v8249_v36 = vld [vmem:[#allocation5 + $0xdb0] sm:$0xff]  }
 0x1a5   :  { %7486 = vmatpush3.bf16.msra.mxu1 %v8193_v4  ;;  %7465 = vmatprep.subr.bf16.mxu0 %v8194_v5  ;;  %v8237_v4 = vld [vmem:[#allocation5 + $0xc88] sm:$0xff]  }
 0x1a6   :  { %7487 = vmatprep.subr.bf16.mxu1 %v8195_v6 }
 0x1a8   :  { %7466 = vmatpush3.bf16.msra.mxu0 %v8196_v7  ;;  %v8238_v7 = vld [vmem:[#allocation5 + $0xc40] sm:$0xff]  }
 0x1a9   :  { %7488 = vmatpush3.bf16.msra.mxu1 %v8197_v8  ;;  %7467 = vmatprep.subr.bf16.mxu0 %v8198_v9  ;;  %v8239_v8 = vld [vmem:[#allocation5 + $0xcc0] sm:$0xff]  }
 0x1aa   :  { %7489 = vmatprep.subr.bf16.mxu1 %v8199_v10 }
 0x1ac   :  { %7468 = vmatpush3.bf16.msra.mxu0 %v8200_v11  ;;  %v8240_v11 = vld [vmem:[#allocation5 + $0xc00] sm:$0xff]  }
 0x1ad   :  { %7490 = vmatpush3.bf16.msra.mxu1 %v8201_v12  ;;  %7469 = vmatprep.subr.bf16.mxu0 %v8202_v13 }
 0x1ae   :  { %7491 = vmatprep.subr.bf16.mxu1 %v8203_v14  ;;  %v8241_v14 = vld [vmem:[#allocation5 + $0xc80] sm:$0xff]  }
 0x1b0   :  { %7470 = vmatpush3.bf16.msra.mxu0 %v8204_v15  ;;  %v120_v15 = vld [vmem:[#allocation2 + $0x188] sm:$0xff] }
 0x1b1   :  { %7492 = vmatpush3.bf16.msra.mxu1 %v8205_v16  ;;  %7471 = vmatprep.subr.bf16.mxu0 %v8206_v18  ;;  %v122_v16 = vld [vmem:[#allocation2 + $0x198] sm:$0xff] }
 0x1b2   :  { %7493 = vmatprep.subr.bf16.mxu1 %v8207_v20  ;;  %v194_v20 = vpack.c.bf16 %v122_v16, %v122_v16  ;;  %v8275_v16 = vld [vmem:[#allocation5 + $0xef8] sm:$0xff]  }
 0x1b4   :  { %7472 = vmatpush3.bf16.msra.mxu0 %v8208_v22  ;;  %v121_v22 = vld [vmem:[#allocation2 + $0x190] sm:$0xff] }
 0x1b5   :  { %7494 = vmatpush3.bf16.msra.mxu1 %v8209_v25  ;;  %7501 = vmatprep.subr.bf16.mxu0 %v8210_v39  ;;  %v193_v25 = vpack.c.bf16 %v121_v22, %v121_v22  ;;  %v8252_v39 = vld [vmem:[#allocation5 + $0xd28] sm:$0xff]   ;;  %v8279_v22 = vld [vmem:[#allocation5 + $0xef0] sm:$0xff]  }
 0x1b6   :  { %7523 = vmatprep.subr.bf16.mxu1 %v8211_v42  ;;  %v8255_v42 = vld [vmem:[#allocation5 + $0xde0] sm:$0xff]  }
 0x1b7   :  { %v7209_v17 = vpop.f32.mrf.mxu0  ;;  %5743 = vmatmul.mubr.bf16.vlgmr.msra.gmra.mxu0 %v187_v35  ;;  %v8248_v35 = vld [vmem:[#allocation5 + $0xd30] sm:$0xff]  }
 0x1b8   :  { %v7231_v19 = vpop.f32.mrf.mxu1  ;;  %5783 = vmatmul.mubr.bf16.vlgmr.msra.gmra.mxu1 %v189_v38  ;;  %7502 = vmatpush3.bf16.msra.mxu0 %v8212_v43  ;;  %v8251_v38 = vld [vmem:[#allocation5 + $0xde8] sm:$0xff]   ;;  %v8256_v43 = vld [vmem:[#allocation5 + $0xd20] sm:$0xff]  }
 0x1b9   :  { %v7210_v21 = vpop.f32.mrf.mxu0  ;;  %7524 = vmatpush3.bf16.msra.mxu1 %v8213_v44  ;;  %7503 = vmatprep.subr.bf16.mxu0 %v8214_v45  ;;  %v8257_v44 = vld [vmem:[#allocation5 + $0xda0] sm:$0xff]   ;;  %v8258_v45 = vld [vmem:[#allocation5 + $0xd58] sm:$0xff]  }
 0x1ba   :  { %v7211_v23 = vadd.f32 %v7210_v21, %v7209_v17  ;;  %v7232_v24 = vpop.f32.mrf.mxu1  ;;  %7525 = vmatprep.subr.bf16.mxu1 %v8215_v46  ;;  %v119_v21 = vld [vmem:[#allocation2 + $0x180] sm:$0xff]  ;;  %5862 = vmatprep.mubr.bf16.mxu1 %v194_v20  ;;  %v8259_v46 = vld [vmem:[#allocation5 + $0xdd8] sm:$0xff]  }
 0x1bb   :  { %v7233_v26 = vadd.f32 %v7232_v24, %v7231_v19  ;;  %v7212_v27 = vpop.f32.mrf.mxu0  ;;  %v192_v19 = vpack.c.bf16 %v120_v15, %v120_v15  ;;  %v191_v24 = vpack.c.bf16 %v119_v21, %v119_v21  ;;  %v8277_v20 = vld [vmem:[#allocation5 + $0xeb8] sm:$0xff]   ;;  %v8278_v21 = vld [vmem:[#allocation5 + $0xe70] sm:$0xff]  }
 0x1bc   :  { %v5265_v31 = vadd.f32 %v7211_v23, %v8577_v53  ;;  %v7234_v32 = vpop.f32.mrf.mxu1  ;;  %7504 = vmatpush3.bf16.msra.mxu0 %v8216_v47  ;;  %v8222_v53 = vld [vmem:[#allocation5 + $0xc60] sm:$0xff]   ;;  %v8260_v47 = vld [vmem:[#allocation5 + $0xd18] sm:$0xff]  }
 0x1bd   :  { %v7213_v37 = vpop.f32.mrf.mxu0  ;;  %7526 = vmatpush3.bf16.msra.mxu1 %v8217_v48  ;;  %7505 = vmatprep.subr.bf16.mxu0 %v8218_v49  ;;  %v8245_v32 = vld [vmem:[#allocation5 + $0xdb8] sm:$0xff]   ;;  %v8262_v49 = vld [vmem:[#allocation5 + $0xd50] sm:$0xff]  }
 0x1be   :  { %v8580_v40 = vadd.f32 %v7233_v26, %v5265_v31  ;;  %v7235_v41 = vpop.f32.mrf.mxu1  ;;  %7527 = vmatprep.subr.bf16.mxu1 %v8219_v50  ;;  %v8242_v26 = vld [vmem:[#allocation5 + $0xd78] sm:$0xff]   ;;  %5822 = vmatprep.mubr.bf16.mxu0 %v192_v19  ;;  %v8250_v37 = vld [vmem:[#allocation5 + $0xd68] sm:$0xff]   ;;  %v8263_v50 = vld [vmem:[#allocation5 + $0xdd0] sm:$0xff]  }
 0x1bf   :  { %v8244_v31 = vld [vmem:[#allocation5 + $0xd38] sm:$0xff]   ;;  %v8254_v41 = vld [vmem:[#allocation5 + $0xd60] sm:$0xff]  }
 0x1c0   :  { %7506 = vmatpush3.bf16.msra.mxu0 %v8220_v51  ;;  %v8261_v48 = vld [vmem:[#allocation5 + $0xd98] sm:$0xff]   ;;  %v8264_v51 = vld [vmem:[#allocation5 + $0xd10] sm:$0xff]  }
 0x1c1   :  { %7528 = vmatpush3.bf16.msra.mxu1 %v8221_v52  ;;  %7507 = vmatprep.subr.bf16.mxu0 %v8222_v53  ;;  %v8265_v52 = vld [vmem:[#allocation5 + $0xd90] sm:$0xff]   ;;  %v8266_v53 = vld [vmem:[#allocation5 + $0xd48] sm:$0xff]   ;;  %v8276_v19 = vld [vmem:[#allocation5 + $0xe38] sm:$0xff]  }
 0x1c2   :  { %7529 = vmatprep.subr.bf16.mxu1 %v8223_v54  ;;  %v8267_v54 = vld [vmem:[#allocation5 + $0xdc8] sm:$0xff]  }
 0x1c4   :  { %7508 = vmatpush3.bf16.msra.mxu0 %v8224_v55  ;;  %v8268_v55 = vld [vmem:[#allocation5 + $0xd08] sm:$0xff]  }
 0x1c5   :  { %7530 = vmatpush3.bf16.msra.mxu1 %v8225_v56  ;;  %7509 = vmatprep.subr.bf16.mxu0 %v8226_v57  ;;  %v8269_v56 = vld [vmem:[#allocation5 + $0xd88] sm:$0xff]  }
 0x1c6   :  { %7531 = vmatprep.subr.bf16.mxu1 %v8227_v58  ;;  %v8270_v58 = vld [vmem:[#allocation5 + $0xd40] sm:$0xff]  }
 0x1c8   :  { %7510 = vmatpush3.bf16.msra.mxu0 %v8228_v59 }
 0x1c9   :  { %7532 = vmatpush3.bf16.msra.mxu1 %v8229_v60  ;;  %7511 = vmatprep.subr.bf16.mxu0 %v8230_v61  ;;  %v8271_v60 = vld [vmem:[#allocation5 + $0xdc0] sm:$0xff]  }
 0x1ca   :  { %7533 = vmatprep.subr.bf16.mxu1 %v8231_v62  ;;  %v8272_v62 = vld [vmem:[#allocation5 + $0xd00] sm:$0xff]  }
 0x1cc   :  { %7512 = vmatpush3.bf16.msra.mxu0 %v8232_v63 }
 0x1cd   :  { %7534 = vmatpush3.bf16.msra.mxu1 %v8233_v0  ;;  %7513 = vmatprep.subr.bf16.mxu0 %v8234_v1  ;;  %v8273_v1 = vld [vmem:[#allocation5 + $0xd80] sm:$0xff]  }
 0x1ce   :  { %7535 = vmatprep.subr.bf16.mxu1 %v8235_v2  ;;  %v124_v2 = vld [vmem:[#allocation2 + $0x1a8] sm:$0xff] }
 0x1d0   :  { %7514 = vmatpush3.bf16.msra.mxu0 %v8236_v3 }
 0x1d1   :  { %7536 = vmatpush3.bf16.msra.mxu1 %v8237_v4  ;;  %7515 = vmatprep.subr.bf16.mxu0 %v8238_v7  ;;  %v123_v7 = vld [vmem:[#allocation2 + $0x1a0] sm:$0xff] }
 0x1d2   :  { %7537 = vmatprep.subr.bf16.mxu1 %v8239_v8  ;;  %v125_v8 = vld [vmem:[#allocation2 + $0x1b0] sm:$0xff] }
 0x1d4   :  { %7516 = vmatpush3.bf16.msra.mxu0 %v8240_v11 }
 0x1d5   :  { %7538 = vmatpush3.bf16.msra.mxu1 %v8241_v14  ;;  %7545 = vmatprep.subr.bf16.mxu0 %v8242_v26  ;;  %v8274_v14 = vld [vmem:[#allocation5 + $0xe78] sm:$0xff]   ;;  %v8283_v26 = vld [vmem:[#allocation5 + $0xee8] sm:$0xff]  }
 0x1d6   :  { %7567 = vmatprep.subr.bf16.mxu1 %v8243_v29  ;;  %v8286_v29 = vld [vmem:[#allocation5 + $0xe60] sm:$0xff]  }
 0x1d7   :  { %v7253_v5 = vpop.f32.mrf.mxu0  ;;  %5823 = vmatmul.mubr.bf16.vlgmr.msra.gmra.mxu0 %v191_v24  ;;  %v8281_v24 = vld [vmem:[#allocation5 + $0xeb0] sm:$0xff]  }
 0x1d8   :  { %v7275_v6 = vpop.f32.mrf.mxu1  ;;  %5863 = vmatmul.mubr.bf16.vlgmr.msra.gmra.mxu1 %v193_v25  ;;  %7546 = vmatpush3.bf16.msra.mxu0 %v8244_v31  ;;  %v8282_v25 = vld [vmem:[#allocation5 + $0xe68] sm:$0xff]   ;;  %v8288_v31 = vld [vmem:[#allocation5 + $0xe20] sm:$0xff]  }
 0x1d9   :  { %v7254_v9 = vpop.f32.mrf.mxu0  ;;  %7568 = vmatpush3.bf16.msra.mxu1 %v8245_v32  ;;  %7547 = vmatprep.subr.bf16.mxu0 %v8246_v33  ;;  %v8289_v32 = vld [vmem:[#allocation5 + $0xea0] sm:$0xff]   ;;  %v8290_v33 = vld [vmem:[#allocation5 + $0xe58] sm:$0xff]  }
 0x1da   :  { %v7276_v10 = vpop.f32.mrf.mxu1  ;;  %v7255_v12 = vadd.f32 %v7254_v9, %v7253_v5  ;;  %7569 = vmatprep.subr.bf16.mxu1 %v8247_v34  ;;  %v196_v5 = vpack.c.bf16 %v124_v2, %v124_v2  ;;  %v8291_v34 = vld [vmem:[#allocation5 + $0xed8] sm:$0xff]  }
 0x1db   :  { %v7277_v13 = vadd.f32 %v7276_v10, %v7275_v6  ;;  %v7256_v17 = vpop.f32.mrf.mxu0  ;;  %v126_v6 = vld [vmem:[#allocation2 + $0x1b8] sm:$0xff] }
 0x1dc   :  { %v7278_v18 = vpop.f32.mrf.mxu1  ;;  %v5345_v23 = vadd.f32 %v7255_v12, %v8580_v40  ;;  %7548 = vmatpush3.bf16.msra.mxu0 %v8248_v35  ;;  %v8253_v40 = vld [vmem:[#allocation5 + $0xda8] sm:$0xff]   ;;  %v198_v11 = vpack.c.bf16 %v126_v6, %v126_v6  ;;  %v195_v12 = vpack.c.bf16 %v123_v7, %v123_v7  ;;  %5902 = vmatprep.mubr.bf16.mxu0 %v196_v5  ;;  %v8292_v35 = vld [vmem:[#allocation5 + $0xe18] sm:$0xff]  }
 0x1dd   :  { %v7257_v27 = vpop.f32.mrf.mxu0  ;;  %7570 = vmatpush3.bf16.msra.mxu1 %v8249_v36  ;;  %7549 = vmatprep.subr.bf16.mxu0 %v8250_v37  ;;  %v8293_v36 = vld [vmem:[#allocation5 + $0xe98] sm:$0xff]   ;;  %v8294_v37 = vld [vmem:[#allocation5 + $0xe50] sm:$0xff]  }
 0x1de   :  { %v7279_v28 = vpop.f32.mrf.mxu1  ;;  %v8583_v30 = vadd.f32 %v7277_v13, %v5345_v23  ;;  %7571 = vmatprep.subr.bf16.mxu1 %v8251_v38  ;;  %v197_v13 = vpack.c.bf16 %v125_v8, %v125_v8  ;;  %5942 = vmatprep.mubr.bf16.mxu1 %v198_v11  ;;  %v8280_v23 = vld [vmem:[#allocation5 + $0xe30] sm:$0xff]   ;;  %v8284_v27 = vld [vmem:[#allocation5 + $0xe28] sm:$0xff]   ;;  %v8306_v2 = vld [vmem:[#allocation5 + $0xf78] sm:$0xff]  }
 0x1df   :  { %v8285_v28 = vld [vmem:[#allocation5 + $0xea8] sm:$0xff]   ;;  %v8295_v38 = vld [vmem:[#allocation5 + $0xed0] sm:$0xff]   ;;  %v8307_v5 = vld [vmem:[#allocation5 + $0xff8] sm:$0xff]  }
 0x1e0   :  { %7550 = vmatpush3.bf16.msra.mxu0 %v8252_v39  ;;  %v8296_v39 = vld [vmem:[#allocation5 + $0xe10] sm:$0xff]   ;;  %v8308_v7 = vld [vmem:[#allocation5 + $0xf38] sm:$0xff]  }
 0x1e1   :  { %7572 = vmatpush3.bf16.msra.mxu1 %v8253_v40  ;;  %7551 = vmatprep.subr.bf16.mxu0 %v8254_v41  ;;  %v8297_v40 = vld [vmem:[#allocation5 + $0xe90] sm:$0xff]   ;;  %v8298_v41 = vld [vmem:[#allocation5 + $0xe48] sm:$0xff]   ;;  %v8309_v8 = vld [vmem:[#allocation5 + $0xfb8] sm:$0xff]  }
 0x1e2   :  { %7573 = vmatprep.subr.bf16.mxu1 %v8255_v42  ;;  %v8299_v42 = vld [vmem:[#allocation5 + $0xec8] sm:$0xff]   ;;  %v8312_v11 = vld [vmem:[#allocation5 + $0xf30] sm:$0xff]  }
 0x1e4   :  { %7552 = vmatpush3.bf16.msra.mxu0 %v8256_v43  ;;  %v8300_v43 = vld [vmem:[#allocation5 + $0xe08] sm:$0xff]  }
 0x1e5   :  { %7574 = vmatpush3.bf16.msra.mxu1 %v8257_v44  ;;  %7553 = vmatprep.subr.bf16.mxu0 %v8258_v45  ;;  %v8301_v44 = vld [vmem:[#allocation5 + $0xe88] sm:$0xff]   ;;  %v8302_v45 = vld [vmem:[#allocation5 + $0xe40] sm:$0xff]  }
 0x1e6   :  { %7575 = vmatprep.subr.bf16.mxu1 %v8259_v46 }
 0x1e8   :  { %7554 = vmatpush3.bf16.msra.mxu0 %v8260_v47 }
 0x1e9   :  { %7576 = vmatpush3.bf16.msra.mxu1 %v8261_v48  ;;  %7555 = vmatprep.subr.bf16.mxu0 %v8262_v49  ;;  %v8303_v48 = vld [vmem:[#allocation5 + $0xec0] sm:$0xff]  }
 0x1ea   :  { %7577 = vmatprep.subr.bf16.mxu1 %v8263_v50  ;;  %v8304_v49 = vld [vmem:[#allocation5 + $0xe00] sm:$0xff]  }
 0x1ec   :  { %7556 = vmatpush3.bf16.msra.mxu0 %v8264_v51 }
 0x1ed   :  { %7578 = vmatpush3.bf16.msra.mxu1 %v8265_v52  ;;  %7557 = vmatprep.subr.bf16.mxu0 %v8266_v53  ;;  %v8305_v52 = vld [vmem:[#allocation5 + $0xe80] sm:$0xff]  }
 0x1ee   :  { %7579 = vmatprep.subr.bf16.mxu1 %v8267_v54 }
 0x1f0   :  { %7558 = vmatpush3.bf16.msra.mxu0 %v8268_v55  ;;  %v128_v55 = vld [vmem:[#allocation2 + $0x1c8] sm:$0xff] }
 0x1f1   :  { %7580 = vmatpush3.bf16.msra.mxu1 %v8269_v56  ;;  %7559 = vmatprep.subr.bf16.mxu0 %v8270_v58  ;;  %v130_v56 = vld [vmem:[#allocation2 + $0x1d8] sm:$0xff] }
 0x1f2   :  { %7581 = vmatprep.subr.bf16.mxu1 %v8271_v60  ;;  %v200_v60 = vpack.c.bf16 %v128_v55, %v128_v55 }
 0x1f4   :  { %7560 = vmatpush3.bf16.msra.mxu0 %v8272_v62 }
 0x1f5   :  { %7582 = vmatpush3.bf16.msra.mxu1 %v8273_v1  ;;  %7589 = vmatprep.subr.bf16.mxu0 %v8274_v14  ;;  %v8315_v14 = vld [vmem:[#allocation5 + $0xfe8] sm:$0xff]  }
 0x1f6   :  { %7611 = vmatprep.subr.bf16.mxu1 %v8275_v16  ;;  %v8317_v16 = vld [vmem:[#allocation5 + $0xfa8] sm:$0xff]  }
 0x1f7   :  { %v7297_v57 = vpop.f32.mrf.mxu0  ;;  %5903 = vmatmul.mubr.bf16.vlgmr.msra.gmra.mxu0 %v195_v12  ;;  %v8313_v12 = vld [vmem:[#allocation5 + $0xfb0] sm:$0xff]  }
 0x1f8   :  { %v7319_v59 = vpop.f32.mrf.mxu1  ;;  %5943 = vmatmul.mubr.bf16.vlgmr.msra.gmra.mxu1 %v197_v13  ;;  %7590 = vmatpush3.bf16.msra.mxu0 %v8276_v19  ;;  %v8314_v13 = vld [vmem:[#allocation5 + $0xf68] sm:$0xff]   ;;  %v8320_v19 = vld [vmem:[#allocation5 + $0xf20] sm:$0xff]  }
 0x1f9   :  { %v7298_v61 = vpop.f32.mrf.mxu0  ;;  %7612 = vmatpush3.bf16.msra.mxu1 %v8277_v20  ;;  %7591 = vmatprep.subr.bf16.mxu0 %v8278_v21  ;;  %v8321_v20 = vld [vmem:[#allocation5 + $0xfa0] sm:$0xff]   ;;  %v8322_v21 = vld [vmem:[#allocation5 + $0xf58] sm:$0xff]  }
 0x1fa   :  { %v7299_v63 = vadd.f32 %v7298_v61, %v7297_v57  ;;  %v7320_v0 = vpop.f32.mrf.mxu1  ;;  %7613 = vmatprep.subr.bf16.mxu1 %v8279_v22  ;;  %v127_v57 = vld [vmem:[#allocation2 + $0x1c0] sm:$0xff]  ;;  %v202_v61 = vpack.c.bf16 %v130_v56, %v130_v56  ;;  %5982 = vmatprep.mubr.bf16.mxu0 %v200_v60  ;;  %v8323_v22 = vld [vmem:[#allocation5 + $0xfd8] sm:$0xff]  }
 0x1fb   :  { %v7321_v3 = vadd.f32 %v7320_v0, %v7319_v59  ;;  %v7300_v4 = vpop.f32.mrf.mxu0  ;;  %v199_v62 = vpack.c.bf16 %v127_v57, %v127_v57  ;;  %v8339_v56 = vld [vmem:[#allocation5 + $0x10f8] sm:$0xff]  }
 0x1fc   :  { %v5425_v9 = vadd.f32 %v7299_v63, %v8583_v30  ;;  %v7322_v10 = vpop.f32.mrf.mxu1  ;;  %7592 = vmatpush3.bf16.msra.mxu0 %v8280_v23  ;;  %v8287_v30 = vld [vmem:[#allocation5 + $0xee0] sm:$0xff]   ;;  %v129_v63 = vld [vmem:[#allocation2 + $0x1d0] sm:$0xff]  ;;  %6022 = vmatprep.mubr.bf16.mxu1 %v202_v61  ;;  %v8324_v23 = vld [vmem:[#allocation5 + $0xf18] sm:$0xff]  }
 0x1fd   :  { %v7301_v15 = vpop.f32.mrf.mxu0  ;;  %7614 = vmatpush3.bf16.msra.mxu1 %v8281_v24  ;;  %7593 = vmatprep.subr.bf16.mxu0 %v8282_v25  ;;  %v201_v1 = vpack.c.bf16 %v129_v63, %v129_v63  ;;  %v8311_v10 = vld [vmem:[#allocation5 + $0xff0] sm:$0xff]   ;;  %v8325_v24 = vld [vmem:[#allocation5 + $0xf98] sm:$0xff]  }
 0x1fe   :  { %v8586_v17 = vadd.f32 %v7321_v3, %v5425_v9  ;;  %v7323_v18 = vpop.f32.mrf.mxu1  ;;  %7615 = vmatprep.subr.bf16.mxu1 %v8283_v26  ;;  %v8310_v9 = vld [vmem:[#allocation5 + $0xf70] sm:$0xff]   ;;  %v8316_v15 = vld [vmem:[#allocation5 + $0xf28] sm:$0xff]   ;;  %v8341_v60 = vld [vmem:[#allocation5 + $0x10b8] sm:$0xff]  }
 0x1ff   :  { %v8319_v18 = vld [vmem:[#allocation5 + $0xfe0] sm:$0xff]   ;;  %v8326_v25 = vld [vmem:[#allocation5 + $0xf50] sm:$0xff]  }
 0x200   :  { %7594 = vmatpush3.bf16.msra.mxu0 %v8284_v27  ;;  %v8327_v26 = vld [vmem:[#allocation5 + $0xfd0] sm:$0xff]  }
 0x201   :  { %7616 = vmatpush3.bf16.msra.mxu1 %v8285_v28  ;;  %7595 = vmatprep.subr.bf16.mxu0 %v8286_v29  ;;  %v8328_v27 = vld [vmem:[#allocation5 + $0xf10] sm:$0xff]   ;;  %v8330_v29 = vld [vmem:[#allocation5 + $0xf48] sm:$0xff]  }
 0x202   :  { %7617 = vmatprep.subr.bf16.mxu1 %v8287_v30  ;;  %v8329_v28 = vld [vmem:[#allocation5 + $0xf90] sm:$0xff]   ;;  %v8331_v30 = vld [vmem:[#allocation5 + $0xfc8] sm:$0xff]  }
 0x203   :  { %v8342_v61 = vld [vmem:[#allocation5 + $0x1070] sm:$0xff]  }
 0x204   :  { %7596 = vmatpush3.bf16.msra.mxu0 %v8288_v31  ;;  %v8332_v31 = vld [vmem:[#allocation5 + $0xf08] sm:$0xff]   ;;  %v8344_v63 = vld [vmem:[#allocation5 + $0x1030] sm:$0xff]  }
 0x205   :  { %7618 = vmatpush3.bf16.msra.mxu1 %v8289_v32  ;;  %7597 = vmatprep.subr.bf16.mxu0 %v8290_v33  ;;  %v8333_v32 = vld [vmem:[#allocation5 + $0xf88] sm:$0xff]  }
 0x206   :  { %7619 = vmatprep.subr.bf16.mxu1 %v8291_v34  ;;  %v8334_v34 = vld [vmem:[#allocation5 + $0xf40] sm:$0xff]  }
 0x208   :  { %7598 = vmatpush3.bf16.msra.mxu0 %v8292_v35 }
 0x209   :  { %7620 = vmatpush3.bf16.msra.mxu1 %v8293_v36  ;;  %7599 = vmatprep.subr.bf16.mxu0 %v8294_v37  ;;  %v8335_v36 = vld [vmem:[#allocation5 + $0xfc0] sm:$0xff]  }
 0x20a   :  { %7621 = vmatprep.subr.bf16.mxu1 %v8295_v38  ;;  %v8336_v38 = vld [vmem:[#allocation5 + $0xf00] sm:$0xff]  }
 0x20c   :  { %7600 = vmatpush3.bf16.msra.mxu0 %v8296_v39 }
 0x20d   :  { %7622 = vmatpush3.bf16.msra.mxu1 %v8297_v40  ;;  %7601 = vmatprep.subr.bf16.mxu0 %v8298_v41  ;;  %v8337_v41 = vld [vmem:[#allocation5 + $0xf80] sm:$0xff]  }
 0x20e   :  { %7623 = vmatprep.subr.bf16.mxu1 %v8299_v42  ;;  %v132_v42 = vld [vmem:[#allocation2 + $0x1e8] sm:$0xff] }
 0x210   :  { %7602 = vmatpush3.bf16.msra.mxu0 %v8300_v43  ;;  %v134_v43 = vld [vmem:[#allocation2 + $0x1f8] sm:$0xff] }
 0x211   :  { %7624 = vmatpush3.bf16.msra.mxu1 %v8301_v44  ;;  %7603 = vmatprep.subr.bf16.mxu0 %v8302_v45 }
 0x212   :  { %7625 = vmatprep.subr.bf16.mxu1 %v8303_v48  ;;  %v131_v48 = vld [vmem:[#allocation2 + $0x1e0] sm:$0xff] }
 0x214   :  { %7604 = vmatpush3.bf16.msra.mxu0 %v8304_v49  ;;  %v133_v49 = vld [vmem:[#allocation2 + $0x1f0] sm:$0xff] }
 0x215   :  { %7626 = vmatpush3.bf16.msra.mxu1 %v8305_v52  ;;  %7633 = vmatprep.subr.bf16.mxu0 %v8306_v2  ;;  %v203_v52 = vpack.c.bf16 %v131_v48, %v131_v48  ;;  %v8347_v2 = vld [vmem:[#allocation5 + $0x10e8] sm:$0xff]   ;;  %v8373_v48 = vld [vmem:[#allocation5 + $0x11b8] sm:$0xff]  }
 0x216   :  { %7655 = vmatprep.subr.bf16.mxu1 %v8307_v5  ;;  %v8350_v5 = vld [vmem:[#allocation5 + $0x1060] sm:$0xff]  }
 0x217   :  { %v7341_v46 = vpop.f32.mrf.mxu0  ;;  %5983 = vmatmul.mubr.bf16.vlgmr.msra.gmra.mxu0 %v199_v62  ;;  %v8343_v62 = vld [vmem:[#allocation5 + $0x10f0] sm:$0xff]  }
 0x218   :  { %v7363_v47 = vpop.f32.mrf.mxu1  ;;  %6023 = vmatmul.mubr.bf16.vlgmr.msra.gmra.mxu1 %v201_v1  ;;  %7634 = vmatpush3.bf16.msra.mxu0 %v8308_v7  ;;  %v8346_v1 = vld [vmem:[#allocation5 + $0x1068] sm:$0xff]   ;;  %v8352_v7 = vld [vmem:[#allocation5 + $0x1020] sm:$0xff]  }
 0x219   :  { %v7342_v50 = vpop.f32.mrf.mxu0  ;;  %7656 = vmatpush3.bf16.msra.mxu1 %v8309_v8  ;;  %7635 = vmatprep.subr.bf16.mxu0 %v8310_v9  ;;  %v8353_v8 = vld [vmem:[#allocation5 + $0x10a0] sm:$0xff]   ;;  %v8354_v9 = vld [vmem:[#allocation5 + $0x1058] sm:$0xff]  }
 0x21a   :  { %v7364_v51 = vpop.f32.mrf.mxu1  ;;  %v7343_v53 = vadd.f32 %v7342_v50, %v7341_v46  ;;  %7657 = vmatprep.subr.bf16.mxu1 %v8311_v10  ;;  %v204_v46 = vpack.c.bf16 %v132_v42, %v132_v42  ;;  %v8355_v10 = vld [vmem:[#allocation5 + $0x10d8] sm:$0xff]  }
 0x21b   :  { %v7365_v54 = vadd.f32 %v7364_v51, %v7363_v47  ;;  %v7344_v58 = vpop.f32.mrf.mxu0  ;;  %v206_v47 = vpack.c.bf16 %v134_v43, %v134_v43  ;;  %v8370_v42 = vld [vmem:[#allocation5 + $0x1178] sm:$0xff]  }
 0x21c   :  { %v7366_v59 = vpop.f32.mrf.mxu1  ;;  %v5505_v0 = vadd.f32 %v7343_v53, %v8586_v17  ;;  %7636 = vmatpush3.bf16.msra.mxu0 %v8312_v11  ;;  %v8318_v17 = vld [vmem:[#allocation5 + $0xf60] sm:$0xff]   ;;  %v205_v53 = vpack.c.bf16 %v133_v49, %v133_v49  ;;  %6062 = vmatprep.mubr.bf16.mxu0 %v204_v46  ;;  %v8356_v11 = vld [vmem:[#allocation5 + $0x1018] sm:$0xff]   ;;  %v8374_v49 = vld [vmem:[#allocation5 + $0x1170] sm:$0xff]  }
 0x21d   :  { %v7345_v3 = vpop.f32.mrf.mxu0  ;;  %7658 = vmatpush3.bf16.msra.mxu1 %v8313_v12  ;;  %7637 = vmatprep.subr.bf16.mxu0 %v8314_v13  ;;  %v8340_v59 = vld [vmem:[#allocation5 + $0x1038] sm:$0xff]   ;;  %v8358_v13 = vld [vmem:[#allocation5 + $0x1050] sm:$0xff]  }
 0x21e   :  { %v7367_v4 = vpop.f32.mrf.mxu1  ;;  %v8589_v6 = vadd.f32 %v7365_v54, %v5505_v0  ;;  %7659 = vmatprep.subr.bf16.mxu1 %v8315_v14  ;;  %v8338_v54 = vld [vmem:[#allocation5 + $0x1078] sm:$0xff]   ;;  %6102 = vmatprep.mubr.bf16.mxu1 %v206_v47  ;;  %v8345_v0 = vld [vmem:[#allocation5 + $0x10b0] sm:$0xff]   ;;  %v8348_v3 = vld [vmem:[#allocation5 + $0x1028] sm:$0xff]  }
 0x21f   :  { %v8349_v4 = vld [vmem:[#allocation5 + $0x10a8] sm:$0xff]   ;;  %v8357_v12 = vld [vmem:[#allocation5 + $0x1098] sm:$0xff]   ;;  %v8359_v14 = vld [vmem:[#allocation5 + $0x10d0] sm:$0xff]  }
 0x220   :  { %7638 = vmatpush3.bf16.msra.mxu0 %v8316_v15  ;;  %v8360_v15 = vld [vmem:[#allocation5 + $0x1010] sm:$0xff]   ;;  %v8372_v47 = vld [vmem:[#allocation5 + $0x1138] sm:$0xff]  }
 0x221   :  { %7660 = vmatpush3.bf16.msra.mxu1 %v8317_v16  ;;  %7639 = vmatprep.subr.bf16.mxu0 %v8318_v17  ;;  %v8361_v16 = vld [vmem:[#allocation5 + $0x1090] sm:$0xff]   ;;  %v8362_v17 = vld [vmem:[#allocation5 + $0x1048] sm:$0xff]  }
 0x222   :  { %7661 = vmatprep.subr.bf16.mxu1 %v8319_v18  ;;  %v8363_v18 = vld [vmem:[#allocation5 + $0x10c8] sm:$0xff]  }
 0x224   :  { %7640 = vmatpush3.bf16.msra.mxu0 %v8320_v19  ;;  %v8364_v19 = vld [vmem:[#allocation5 + $0x1008] sm:$0xff]  }
 0x225   :  { %7662 = vmatpush3.bf16.msra.mxu1 %v8321_v20  ;;  %7641 = vmatprep.subr.bf16.mxu0 %v8322_v21  ;;  %v8365_v20 = vld [vmem:[#allocation5 + $0x1088] sm:$0xff]  }
 0x226   :  { %7663 = vmatprep.subr.bf16.mxu1 %v8323_v22  ;;  %v8366_v22 = vld [vmem:[#allocation5 + $0x1040] sm:$0xff]  }
 0x228   :  { %7642 = vmatpush3.bf16.msra.mxu0 %v8324_v23 }
 0x229   :  { %7664 = vmatpush3.bf16.msra.mxu1 %v8325_v24  ;;  %7643 = vmatprep.subr.bf16.mxu0 %v8326_v25  ;;  %v8367_v24 = vld [vmem:[#allocation5 + $0x10c0] sm:$0xff]  }
 0x22a   :  { %7665 = vmatprep.subr.bf16.mxu1 %v8327_v26  ;;  %v8368_v26 = vld [vmem:[#allocation5 + $0x1000] sm:$0xff]  }
 0x22c   :  { %7644 = vmatpush3.bf16.msra.mxu0 %v8328_v27 }
 0x22d   :  { %7666 = vmatpush3.bf16.msra.mxu1 %v8329_v28  ;;  %7645 = vmatprep.subr.bf16.mxu0 %v8330_v29  ;;  %v8369_v29 = vld [vmem:[#allocation5 + $0x1080] sm:$0xff]  }
 0x22e   :  { %7667 = vmatprep.subr.bf16.mxu1 %v8331_v30  ;;  %v136_v30 = vld [vmem:[#allocation2 + $0x208] sm:$0xff] }
 0x230   :  { %7646 = vmatpush3.bf16.msra.mxu0 %v8332_v31 }
 0x231   :  { %7668 = vmatpush3.bf16.msra.mxu1 %v8333_v32  ;;  %7647 = vmatprep.subr.bf16.mxu0 %v8334_v34  ;;  %v138_v34 = vld [vmem:[#allocation2 + $0x218] sm:$0xff] }
 0x232   :  { %7669 = vmatprep.subr.bf16.mxu1 %v8335_v36  ;;  %v137_v36 = vld [vmem:[#allocation2 + $0x210] sm:$0xff] }
 0x234   :  { %7648 = vmatpush3.bf16.msra.mxu0 %v8336_v38 }
 0x235   :  { %7670 = vmatpush3.bf16.msra.mxu1 %v8337_v41  ;;  %7677 = vmatprep.subr.bf16.mxu0 %v8338_v54  ;;  %v209_v41 = vpack.c.bf16 %v137_v36, %v137_v36  ;;  %v8379_v54 = vld [vmem:[#allocation5 + $0x11e8] sm:$0xff]  }
 0x236   :  { %7699 = vmatprep.subr.bf16.mxu1 %v8339_v56  ;;  %v8381_v56 = vld [vmem:[#allocation5 + $0x11a8] sm:$0xff]  }
 0x237   :  { %v7385_v33 = vpop.f32.mrf.mxu0  ;;  %6063 = vmatmul.mubr.bf16.vlgmr.msra.gmra.mxu0 %v203_v52  ;;  %v8377_v52 = vld [vmem:[#allocation5 + $0x11b0] sm:$0xff]  }
 0x238   :  { %v7407_v35 = vpop.f32.mrf.mxu1  ;;  %6103 = vmatmul.mubr.bf16.vlgmr.msra.gmra.mxu1 %v205_v53  ;;  %7678 = vmatpush3.bf16.msra.mxu0 %v8340_v59  ;;  %v8378_v53 = vld [vmem:[#allocation5 + $0x1168] sm:$0xff]   ;;  %v8384_v59 = vld [vmem:[#allocation5 + $0x1120] sm:$0xff]  }
 0x239   :  { %v7386_v37 = vpop.f32.mrf.mxu0  ;;  %7700 = vmatpush3.bf16.msra.mxu1 %v8341_v60  ;;  %7679 = vmatprep.subr.bf16.mxu0 %v8342_v61  ;;  %v8385_v60 = vld [vmem:[#allocation5 + $0x11a0] sm:$0xff]   ;;  %v8386_v61 = vld [vmem:[#allocation5 + $0x1158] sm:$0xff]  }
 0x23a   :  { %v7387_v39 = vadd.f32 %v7386_v37, %v7385_v33  ;;  %v7408_v40 = vpop.f32.mrf.mxu1  ;;  %7701 = vmatprep.subr.bf16.mxu1 %v8343_v62  ;;  %v208_v33 = vpack.c.bf16 %v136_v30, %v136_v30  ;;  %v8387_v62 = vld [vmem:[#allocation5 + $0x11d8] sm:$0xff]  }
 0x23b   :  { %v7409_v44 = vadd.f32 %v7408_v40, %v7407_v35  ;;  %v7388_v45 = vpop.f32.mrf.mxu0  ;;  %v135_v35 = vld [vmem:[#allocation2 + $0x200] sm:$0xff] }
 0x23c   :  { %v5585_v50 = vadd.f32 %v7387_v39, %v8589_v6  ;;  %v7410_v51 = vpop.f32.mrf.mxu1  ;;  %7680 = vmatpush3.bf16.msra.mxu0 %v8344_v63  ;;  %v8351_v6 = vld [vmem:[#allocation5 + $0x10e0] sm:$0xff]   ;;  %v210_v39 = vpack.c.bf16 %v138_v34, %v138_v34  ;;  %v207_v40 = vpack.c.bf16 %v135_v35, %v135_v35  ;;  %6142 = vmatprep.mubr.bf16.mxu0 %v208_v33  ;;  %v8388_v63 = vld [vmem:[#allocation5 + $0x1118] sm:$0xff]  }
 0x23d   :  { %v7389_v55 = vpop.f32.mrf.mxu0  ;;  %7702 = vmatpush3.bf16.msra.mxu1 %v8345_v0  ;;  %7681 = vmatprep.subr.bf16.mxu0 %v8346_v1  ;;  %v8376_v51 = vld [vmem:[#allocation5 + $0x1130] sm:$0xff]   ;;  %v8389_v0 = vld [vmem:[#allocation5 + $0x1198] sm:$0xff]  }
 0x23e   :  { %v8592_v57 = vadd.f32 %v7409_v44, %v5585_v50  ;;  %v7411_v58 = vpop.f32.mrf.mxu1  ;;  %7703 = vmatprep.subr.bf16.mxu1 %v8347_v2  ;;  %v8371_v44 = vld [vmem:[#allocation5 + $0x11f8] sm:$0xff]   ;;  %6182 = vmatprep.mubr.bf16.mxu1 %v210_v39  ;;  %v8375_v50 = vld [vmem:[#allocation5 + $0x11f0] sm:$0xff]   ;;  %v8380_v55 = vld [vmem:[#allocation5 + $0x1128] sm:$0xff]  }
 0x23f   :  { %v8383_v58 = vld [vmem:[#allocation5 + $0x11e0] sm:$0xff]   ;;  %v8390_v1 = vld [vmem:[#allocation5 + $0x1150] sm:$0xff]  }
 0x240   :  { %7682 = vmatpush3.bf16.msra.mxu0 %v8348_v3  ;;  %v8391_v2 = vld [vmem:[#allocation5 + $0x11d0] sm:$0xff]  }
 0x241   :  { %7704 = vmatpush3.bf16.msra.mxu1 %v8349_v4  ;;  %7683 = vmatprep.subr.bf16.mxu0 %v8350_v5  ;;  %v8392_v3 = vld [vmem:[#allocation5 + $0x1110] sm:$0xff]   ;;  %v8394_v5 = vld [vmem:[#allocation5 + $0x1148] sm:$0xff]  }
 0x242   :  { %7705 = vmatprep.subr.bf16.mxu1 %v8351_v6  ;;  %v8393_v4 = vld [vmem:[#allocation5 + $0x1190] sm:$0xff]   ;;  %v8395_v6 = vld [vmem:[#allocation5 + $0x11c8] sm:$0xff]  }
 0x244   :  { %7684 = vmatpush3.bf16.msra.mxu0 %v8352_v7  ;;  %v8396_v7 = vld [vmem:[#allocation5 + $0x1108] sm:$0xff]  }
 0x245   :  { %7706 = vmatpush3.bf16.msra.mxu1 %v8353_v8  ;;  %7685 = vmatprep.subr.bf16.mxu0 %v8354_v9  ;;  %v8397_v8 = vld [vmem:[#allocation5 + $0x1188] sm:$0xff]   ;;  %v8398_v9 = vld [vmem:[#allocation5 + $0x1140] sm:$0xff]  }
 0x246   :  { %7707 = vmatprep.subr.bf16.mxu1 %v8355_v10 }
 0x248   :  { %7686 = vmatpush3.bf16.msra.mxu0 %v8356_v11 }
 0x249   :  { %7708 = vmatpush3.bf16.msra.mxu1 %v8357_v12  ;;  %7687 = vmatprep.subr.bf16.mxu0 %v8358_v13  ;;  %v8399_v12 = vld [vmem:[#allocation5 + $0x11c0] sm:$0xff]  }
 0x24a   :  { %7709 = vmatprep.subr.bf16.mxu1 %v8359_v14  ;;  %v8400_v13 = vld [vmem:[#allocation5 + $0x1100] sm:$0xff]  }
 0x24c   :  { %7688 = vmatpush3.bf16.msra.mxu0 %v8360_v15 }
 0x24d   :  { %7710 = vmatpush3.bf16.msra.mxu1 %v8361_v16  ;;  %7689 = vmatprep.subr.bf16.mxu0 %v8362_v17  ;;  %v8401_v16 = vld [vmem:[#allocation5 + $0x1180] sm:$0xff]  }
 0x24e   :  { %7711 = vmatprep.subr.bf16.mxu1 %v8363_v18 }
 0x250   :  { %7690 = vmatpush3.bf16.msra.mxu0 %v8364_v19  ;;  %v140_v19 = vld [vmem:[#allocation2 + $0x228] sm:$0xff] }
 0x251   :  { %7712 = vmatpush3.bf16.msra.mxu1 %v8365_v20  ;;  %7691 = vmatprep.subr.bf16.mxu0 %v8366_v22  ;;  %v142_v20 = vld [vmem:[#allocation2 + $0x238] sm:$0xff] }
 0x252   :  { %7713 = vmatprep.subr.bf16.mxu1 %v8367_v24  ;;  %v212_v24 = vpack.c.bf16 %v140_v19, %v140_v19 }
 0x254   :  { %7692 = vmatpush3.bf16.msra.mxu0 %v8368_v26 }
 0x255   :  { %7714 = vmatpush3.bf16.msra.mxu1 %v8369_v29  ;;  %7721 = vmatprep.subr.bf16.mxu0 %v8370_v42 }
 0x256   :  { %7743 = vmatprep.subr.bf16.mxu1 %v8371_v44 }
 0x257   :  { %v7429_v21 = vpop.f32.mrf.mxu0  ;;  %6143 = vmatmul.mubr.bf16.vlgmr.msra.gmra.mxu0 %v207_v40 }
 0x258   :  { %v7451_v23 = vpop.f32.mrf.mxu1  ;;  %6183 = vmatmul.mubr.bf16.vlgmr.msra.gmra.mxu1 %v209_v41  ;;  %7722 = vmatpush3.bf16.msra.mxu0 %v8372_v47  ;;  %v6285_v47 = vld [vmem:[%s8655_s3 + $0x70] sm:$0xff] }
 0x259   :  { %v7430_v25 = vpop.f32.mrf.mxu0  ;;  %7744 = vmatpush3.bf16.msra.mxu1 %v8373_v48  ;;  %7723 = vmatprep.subr.bf16.mxu0 %v8374_v49  ;;  %v6284_v48 = vld [vmem:[%s8655_s3 + $0x68] sm:$0xff]  ;;  %v6283_v49 = vld [vmem:[%s8655_s3 + $0x60] sm:$0xff] }
 0x25a   :  { %v7431_v27 = vadd.f32 %v7430_v25, %v7429_v21  ;;  %v7452_v28 = vpop.f32.mrf.mxu1  ;;  %7745 = vmatprep.subr.bf16.mxu1 %v8375_v50  ;;  %v139_v21 = vld [vmem:[#allocation2 + $0x220] sm:$0xff]  ;;  %v214_v25 = vpack.c.bf16 %v142_v20, %v142_v20  ;;  %6222 = vmatprep.mubr.bf16.mxu0 %v212_v24  ;;  %v6282_v50 = vld [vmem:[%s8655_s3 + $0x58] sm:$0xff] }
 0x25b   :  { %v7453_v31 = vadd.f32 %v7452_v28, %v7451_v23  ;;  %v7432_v32 = vpop.f32.mrf.mxu0  ;;  %v211_v26 = vpack.c.bf16 %v139_v21, %v139_v21 }
 0x25c   :  { %v5665_v37 = vadd.f32 %v7431_v27, %v8592_v57  ;;  %v7454_v38 = vpop.f32.mrf.mxu1  ;;  %7724 = vmatpush3.bf16.msra.mxu0 %v8376_v51  ;;  %v8382_v57 = vld [vmem:[#allocation5 + $0x1160] sm:$0xff]   ;;  %v141_v27 = vld [vmem:[#allocation2 + $0x230] sm:$0xff]  ;;  %6262 = vmatprep.mubr.bf16.mxu1 %v214_v25 }
 0x25d   :  { %v7433_v43 = vpop.f32.mrf.mxu0  ;;  %7746 = vmatpush3.bf16.msra.mxu1 %v8377_v52  ;;  %7725 = vmatprep.subr.bf16.mxu0 %v8378_v53  ;;  %v213_v29 = vpack.c.bf16 %v141_v27, %v141_v27  ;;  %v6281_v51 = vld [vmem:[%s8655_s3 + $0x50] sm:$0xff]  ;;  %v6280_v52 = vld [vmem:[%s8655_s3 + $0x48] sm:$0xff]  ;;  %v6279_v53 = vld [vmem:[%s8655_s3 + $0x40] sm:$0xff] }
 0x25e   :  { %v8595_v45 = vadd.f32 %v7453_v31, %v5665_v37  ;;  %v7455_v46 = vpop.f32.mrf.mxu1  ;;  %7747 = vmatprep.subr.bf16.mxu1 %v8379_v54  ;;  %v6278_v54 = vld [vmem:[%s8655_s3 + $0x38] sm:$0xff] }
 0x25f   :  { %v8520_v46 = vmov 0.0  }
 0x260   :  { %7726 = vmatpush3.bf16.msra.mxu0 %v8380_v55  ;;  %v6277_v55 = vld [vmem:[%s8655_s3 + $0x30] sm:$0xff] }
 0x261   :  { %7748 = vmatpush3.bf16.msra.mxu1 %v8381_v56  ;;  %7727 = vmatprep.subr.bf16.mxu0 %v8382_v57 }
 0x262   :  { %7749 = vmatprep.subr.bf16.mxu1 %v8383_v58 }
 0x264   :  { %7728 = vmatpush3.bf16.msra.mxu0 %v8384_v59 }
 0x265   :  { %7750 = vmatpush3.bf16.msra.mxu1 %v8385_v60  ;;  %7729 = vmatprep.subr.bf16.mxu0 %v8386_v61 }
 0x266   :  { %7751 = vmatprep.subr.bf16.mxu1 %v8387_v62 }
 0x268   :  { %7730 = vmatpush3.bf16.msra.mxu0 %v8388_v63 }
 0x269   :  { %7752 = vmatpush3.bf16.msra.mxu1 %v8389_v0  ;;  %7731 = vmatprep.subr.bf16.mxu0 %v8390_v1  ;;  %v6276_v1 = vld [vmem:[%s8655_s3 + $0x28] sm:$0xff] }
 0x26a   :  { %7753 = vmatprep.subr.bf16.mxu1 %v8391_v2 }
 0x26c   :  { %7732 = vmatpush3.bf16.msra.mxu0 %v8392_v3 }
 0x26d   :  { %7754 = vmatpush3.bf16.msra.mxu1 %v8393_v4  ;;  %7733 = vmatprep.subr.bf16.mxu0 %v8394_v5  ;;  %v6275_v5 = vld [vmem:[%s8655_s3 + $0x20] sm:$0xff] }
 0x26e   :  { %7755 = vmatprep.subr.bf16.mxu1 %v8395_v6  ;;  %v6274_v6 = vld [vmem:[%s8655_s3 + $0x18] sm:$0xff] }
 0x270   :  { %7734 = vmatpush3.bf16.msra.mxu0 %v8396_v7  ;;  %v6273_v7 = vld [vmem:[%s8655_s3 + $0x10] sm:$0xff] }
 0x271   :  { %7756 = vmatpush3.bf16.msra.mxu1 %v8397_v8  ;;  %7735 = vmatprep.subr.bf16.mxu0 %v8398_v9  ;;  %v6272_v8 = vld [vmem:[%s8655_s3 + $0x8] sm:$0xff]  ;;  %v6271_v9 = vld [vmem:[%s8655_s3] sm:$0xff] }
 0x272   :  { %7757 = vmatprep.subr.bf16.mxu1 %v8399_v12 }
 0x274   :  { %7736 = vmatpush3.bf16.msra.mxu0 %v8400_v13 }
 0x275   :  { %7758 = vmatpush3.bf16.msra.mxu1 %v8401_v16  ;;  %7782 = vmatprep.subr.mxu0 %v8520_v46 }
 0x277   :  { %v7473_v10 = vpop.f32.mrf.mxu0  ;;  %6223 = vmatmul.mubr.bf16.vlgmr.msra.gmra.mxu0 %v211_v26 }
 0x278   :  { %v7495_v11 = vpop.f32.mrf.mxu1  ;;  %6263 = vmatmul.mubr.bf16.vlgmr.msra.gmra.mxu1 %v213_v29  ;;  %7814 = vmatprep.mubr.msk.f32.mxu0 %vm8521_vm0, %v8520_v46 }
 0x279   :  { %v7474_v14 = vpop.f32.mrf.mxu0 }
 0x27a   :  { %v7496_v15 = vpop.f32.mrf.mxu1  ;;  %v7475_v17 = vadd.f32 %v7474_v14, %v7473_v10 }
 0x27b   :  { %v7497_v18 = vadd.f32 %v7496_v15, %v7495_v11  ;;  %v7476_v22 = vpop.f32.mrf.mxu0 }
 0x27c   :  { %v7498_v23 = vpop.f32.mrf.mxu1  ;;  %v5745_v28 = vadd.f32 %v7475_v17, %v8595_v45  ;;  %v6286_v45 = vld [vmem:[%s8655_s3 + $0x78] sm:$0xff]  ;;  %s8522_s3 = smov [#allocation10]  }
 0x27d   :  { %v7477_v30 = vpop.f32.mrf.mxu0  ;;  %7783 = vmatpush3.msra.mxu0 %v6286_v45  ;;  %s6384_s16 = sshll.u32 %s8522_s3, 4  ;;  %s6385_s16 = int_to_ptr.vmem [resolvable:$true] %s6384_s16 }
 0x27e   :  { %v7499_v31 = vpop.f32.mrf.mxu1  ;;  %v5785_v32 = vadd.f32 %v7497_v18, %v5745_v28  ;;  %7784 = vmatprep.subr.mxu0 %v8520_v46  ;;  %s8486_s17 = scalar_lea.vmem %s6385_s16, 128  ;;  %p8491_p7 = scmp.lt.s32.totalorder %s6385_s16, %s6385_s16 }
 0x27f   :  { %7785 = vmatpush3.msra.mxu0 %v6285_v47  ;;  %p8487_p6 = scmp.ne.s32.totalorder %s6385_s16, %s8486_s17  ;;  %p8492_p8 = scmp.lt.s32.totalorder %s8486_s17, %s8486_s17 }
 0x280   :  { %7786 = vmatprep.subr.mxu0 %v8520_v46 }
 0x281   :  { %7787 = vmatpush3.msra.mxu0 %v6284_v48  ;;  %p8493_p9 = por %p8492_p8, %p8491_p7 }
 0x282   :  { %7788 = vmatprep.subr.mxu0 %v8520_v46 }
 0x283   :  { %7789 = vmatpush3.msra.mxu0 %v6283_v49  ;;  %p8494_p10 = pnand %p8493_p9, %p8487_p6 }
 0x284   :  { %7790 = vmatprep.subr.mxu0 %v8520_v46 }
 0x285   :  { %7791 = vmatpush3.msra.mxu0 %v6282_v50 }
 0x286   :  { %7792 = vmatprep.subr.mxu0 %v8520_v46 }
 0x287   :  { %7793 = vmatpush3.msra.mxu0 %v6281_v51 }
 0x288   :  { %7794 = vmatprep.subr.mxu0 %v8520_v46 }
 0x289   :  { %7795 = vmatpush3.msra.mxu0 %v6280_v52 }
 0x28a   :  { %7796 = vmatprep.subr.mxu0 %v8520_v46 }
 0x28b   :  { %7797 = vmatpush3.msra.mxu0 %v6279_v53 }
 0x28c   :  { %7798 = vmatprep.subr.mxu0 %v8520_v46 }
 0x28d   :  { %7799 = vmatpush3.msra.mxu0 %v6278_v54 }
 0x28e   :  { %7800 = vmatprep.subr.mxu0 %v8520_v46 }
 0x28f   :  { %7801 = vmatpush3.msra.mxu0 %v6277_v55 }
 0x290   :  { %7802 = vmatprep.subr.mxu0 %v8520_v46 }
 0x291   :  { %7803 = vmatpush3.msra.mxu0 %v6276_v1 }
 0x292   :  { %7804 = vmatprep.subr.mxu0 %v8520_v46 }
 0x293   :  { %7805 = vmatpush3.msra.mxu0 %v6275_v5 }
 0x294   :  { %7806 = vmatprep.subr.mxu0 %v8520_v46 }
 0x295   :  { %7807 = vmatpush3.msra.mxu0 %v6274_v6 }
 0x296   :  { %7808 = vmatprep.subr.mxu0 %v8520_v46 }
 0x297   :  { %v7517_v33 = vpop.f32.mrf.mxu0  ;;  %7809 = vmatpush3.msra.mxu0 %v6273_v7 }
 0x298   :  { %v7539_v34 = vpop.f32.mrf.mxu1  ;;  %7810 = vmatprep.subr.mxu0 %v8520_v46 }
 0x299   :  { %v7518_v35 = vpop.f32.mrf.mxu0  ;;  %7811 = vmatpush3.msra.mxu0 %v6272_v8 }
 0x29a   :  { %v7519_v36 = vadd.f32 %v7518_v35, %v7517_v33  ;;  %v7540_v37 = vpop.f32.mrf.mxu1  ;;  %7812 = vmatprep.subr.mxu0 %v8520_v46 }
 0x29b   :  { %v7541_v38 = vadd.f32 %v7540_v37, %v7539_v34  ;;  %v7520_v39 = vpop.f32.mrf.mxu0  ;;  %7813 = vmatpush3.msra.mxu0 %v6271_v9 }
 0x29c   :  { %v5825_v40 = vadd.f32 %v7519_v36, %v5785_v32  ;;  %v7542_v41 = vpop.f32.mrf.mxu1 }
 0x29d   :  { %v7521_v42 = vpop.f32.mrf.mxu0 }
 0x29e   :  { %v5865_v43 = vadd.f32 %v7541_v38, %v5825_v40  ;;  %v7543_v44 = vpop.f32.mrf.mxu1 }
 0x2b7   :  { %v7561_v56 = vpop.f32.mrf.mxu0 }
 0x2b8   :  { %v7583_v57 = vpop.f32.mrf.mxu1 }
 0x2b9   :  { %v7562_v58 = vpop.f32.mrf.mxu0 }
 0x2ba   :  { %v7563_v59 = vadd.f32 %v7562_v58, %v7561_v56  ;;  %v7584_v60 = vpop.f32.mrf.mxu1 }
 0x2bb   :  { %v7585_v61 = vadd.f32 %v7584_v60, %v7583_v57  ;;  %v7564_v62 = vpop.f32.mrf.mxu0 }
 0x2bc   :  { %v5905_v63 = vadd.f32 %v7563_v59, %v5865_v43  ;;  %v7586_v0 = vpop.f32.mrf.mxu1  ;;  %v6972_v59 = vld [vmem:[#allocation8] ss:$0 sm:$0xff] }
 0x2bd   :  { %v7565_v2 = vpop.f32.mrf.mxu0 }
 0x2be   :  { %v5945_v3 = vadd.f32 %v7585_v61, %v5905_v63  ;;  %v7587_v4 = vpop.f32.mrf.mxu1 }
 0x2d7   :  { %v7605_v10 = vpop.f32.mrf.mxu0 }
 0x2d8   :  { %v7627_v11 = vpop.f32.mrf.mxu1 }
 0x2d9   :  { %v7606_v12 = vpop.f32.mrf.mxu0 }
 0x2da   :  { %v7628_v13 = vpop.f32.mrf.mxu1  ;;  %v7607_v14 = vadd.f32 %v7606_v12, %v7605_v10 }
 0x2db   :  { %v7629_v15 = vadd.f32 %v7628_v13, %v7627_v11  ;;  %v7608_v16 = vpop.f32.mrf.mxu0 }
 0x2dc   :  { %v7630_v17 = vpop.f32.mrf.mxu1  ;;  %v5985_v18 = vadd.f32 %v7607_v14, %v5945_v3 }
 0x2dd   :  { %v7609_v19 = vpop.f32.mrf.mxu0 }
 0x2de   :  { %v7631_v20 = vpop.f32.mrf.mxu1  ;;  %v6025_v21 = vadd.f32 %v7629_v15, %v5985_v18 }
 0x2f7   :  { %v7649_v22 = vpop.f32.mrf.mxu0 }
 0x2f8   :  { %v7671_v23 = vpop.f32.mrf.mxu1 }
 0x2f9   :  { %v7650_v24 = vpop.f32.mrf.mxu0 }
 0x2fa   :  { %v7672_v25 = vpop.f32.mrf.mxu1  ;;  %v7651_v38 = vadd.f32 %v7650_v24, %v7649_v22 }
 0x2fb   :  { %v7652_v26 = vpop.f32.mrf.mxu0  ;;  %v7673_v40 = vadd.f32 %v7672_v25, %v7671_v23 }
 0x2fc   :  { %v7674_v27 = vpop.f32.mrf.mxu1  ;;  %v6065_v39 = vadd.f32 %v7651_v38, %v6025_v21 }
 0x2fd   :  { %v7653_v28 = vpop.f32.mrf.mxu0 }
 0x2fe   :  { %v7675_v29 = vpop.f32.mrf.mxu1  ;;  %v6105_v42 = vadd.f32 %v7673_v40, %v6065_v39 }
 0x317   :  { %v7693_v30 = vpop.f32.mrf.mxu0 }
 0x318   :  { %v7715_v31 = vpop.f32.mrf.mxu1 }
 0x319   :  { %v7694_v32 = vpop.f32.mrf.mxu0 }
 0x31a   :  { %v7716_v33 = vpop.f32.mrf.mxu1  ;;  %v7695_v41 = vadd.f32 %v7694_v32, %v7693_v30 }
 0x31b   :  { %v7696_v34 = vpop.f32.mrf.mxu0  ;;  %v7717_v44 = vadd.f32 %v7716_v33, %v7715_v31 }
 0x31c   :  { %v7718_v35 = vpop.f32.mrf.mxu1  ;;  %v6145_v43 = vadd.f32 %v7695_v41, %v6105_v42 }
 0x31d   :  { %v7697_v36 = vpop.f32.mrf.mxu0 }
 0x31e   :  { %v7719_v37 = vpop.f32.mrf.mxu1  ;;  %v6185_v49 = vadd.f32 %v7717_v44, %v6145_v43 }
 0x337   :  { %v7737_v45 = vpop.f32.mrf.mxu0 }
 0x338   :  { %v7759_v46 = vpop.f32.mrf.mxu1 }
 0x339   :  { %v7738_v47 = vpop.f32.mrf.mxu0 }
 0x33a   :  { %v7760_v48 = vpop.f32.mrf.mxu1  ;;  %v7739_v50 = vadd.f32 %v7738_v47, %v7737_v45 }
 0x33b   :  { %v7740_v51 = vpop.f32.mrf.mxu0  ;;  %v7761_v54 = vadd.f32 %v7760_v48, %v7759_v46 }
 0x33c   :  { %v7762_v52 = vpop.f32.mrf.mxu1  ;;  %v6225_v53 = vadd.f32 %v7739_v50, %v6185_v49 }
 0x33d   :  { %v7741_v55 = vpop.f32.mrf.mxu0 }
 0x33e   :  { %v7763_v56 = vpop.f32.mrf.mxu1  ;;  %v6265_v57 = vadd.f32 %v7761_v54, %v6225_v53 }
 0x340   :  { %v6270_v58 = vmax.f32 %v6265_v57, 0.0 }
 0x342   :  { %7815 = vmatmul.mubr.f32.vlgmr.msra.gmra.mxu0 %v6270_v58 }
 0x402   :  { %v6360_v60 = vpop.f32.mrf.mxu0 }
 0x403   :  { %v6361_v61 = vadd.f32 %v6972_v59, %v6360_v60 }
 0x404   :  { %v7816_v62 = vpop.f32.mrf.mxu0 }
 0x405   :  { %v6365_v63 = vsel %vm6364_vm1, %v6361_v61, -inf }
 0x406   :  { %6366 = vmax.xlane.f32.xlu0 %v6365_v63 }
 0x48f   :  { %v6367_v0 = vpop.xlane.xlu0 %6366 }
 0x490   :  { %v6368_v1 = vsub.f32 %v6361_v61, %v6367_v0 }
 0x492   :  { %v6369_v2 = vmul.f32 1.442695, %v6368_v1 }
 0x494   :  { %8402 = vpow2.f32 %v6369_v2 }
 0x4a1   :  { %v8403_v3 = vpop.eup %8402 }
 0x4a2   :  { %v6371_v4 = vsel %vm6364_vm1, %v8403_v3, 0.0 }
 0x4a3   :  { %6372 = vadd.xlane.f32.xlu0 %v6371_v4 }
 0x52c   :  { %v6373_v5 = vpop.xlane.xlu0 %6372 }
 0x52d   :  { %8404 = vlog2.f32 %v6373_v5 }
 0x53a   :  { %v8405_v6 = vpop.eup %8404 }
 0x53b   :  { %v6375_v7 = vmul.f32 0.6931472, %v8405_v6 }
 0x53d   :  { %v6376_v8 = vsub.f32 %v6368_v1, %v6375_v7 }
 0x53f   :  { %6377 = vst.msk [vmem:[#allocation10] sm:$0xff] %vm6364_vm1, %v6376_v8 }
 0x540   :  { %8497 = shalt.err (!%p8494_p10)
}
 0x541   :  { %6387 = dma.vmem_to_hbm [thread:$0]  %s6385_s16, 128, %s8657_s5, [#allocation4]  }
 0x542   :  { %8512 = dma.done.wait [#allocation4], 128  }
 0x543   :  { %8513 = vsyncadd [#allocation4], 4294967168 }
 0x544   :  { %6391 = vsyncpa [#allocation3], 1 }
 0x545   :  { %6392 = vsyncpa [#allocation6], 1 }
 0x546   :  { %6393 = vsyncpa [#allocation9], 1 }
 0x547   :  { %6394 = vsyncpa [#allocation4], 1 }

</bundles_post_ra>
